<compile_context>
chip_gen: v7x
topology: tpu7x:2x2x1
jax: 0.10.0
libtpu: 0.0.40
codegen_flags: <defaults>
</compile_context>

<pallas_src>
import jax
import jax.numpy as jnp
from jax.experimental import pallas as pl
from jax.experimental.pallas import tpu as pltpu

HID = 128            # hidden_size (module default)
GATES = 4 * HID      # LSTM gate width (i, f, g, o)
OUT_PAD = 128        # final 1-wide output padded to a full lane width


def _sigmoid(x):
    return 1.0 / (1.0 + jnp.exp(-x))


def _lstm_q_kernel(hist_ref, oa_ref,
                   w_pre_ref, b_pre_ref,
                   w_ih_ref, w_hh_ref, b_lstm_ref,
                   w_after_ref, b_after_ref,
                   w_cur_ref, b_cur_ref,
                   w_pc1m_ref, w_pc1c_ref, b_pc1_ref,
                   w_pc2_ref, b_pc2_ref,
                   o_ref, h_scr, c_scr):
    t = pl.program_id(1)

    @pl.when(t == 0)
    def _():
        h_scr[...] = jnp.zeros_like(h_scr)
        c_scr[...] = jnp.zeros_like(c_scr)

    # mem_pre_lstm: Linear + ReLU on this timestep's history slice.
    x_t = hist_ref[0]                                            # (TB, obs_pad)
    x_pre = jnp.maximum(
        jnp.dot(x_t, w_pre_ref[...], preferred_element_type=jnp.float32)
        + b_pre_ref[...], 0.0)

    # LSTM cell (PyTorch gate order: i, f, g, o).
    h = h_scr[...]
    c = c_scr[...]
    gates = (jnp.dot(x_pre, w_ih_ref[...], preferred_element_type=jnp.float32)
             + jnp.dot(h, w_hh_ref[...], preferred_element_type=jnp.float32)
             + b_lstm_ref[...])
    i_g = _sigmoid(gates[:, 0 * HID:1 * HID])
    f_g = _sigmoid(gates[:, 1 * HID:2 * HID])
    g_g = jnp.tanh(gates[:, 2 * HID:3 * HID])
    o_g = _sigmoid(gates[:, 3 * HID:4 * HID])
    c_new = f_g * c + i_g * g_g
    h_new = o_g * jnp.tanh(c_new)
    h_scr[...] = h_new
    c_scr[...] = c_new

    # Only the last timestep feeds the head, so the after-LSTM MLP, the
    # current-feature MLP and the post-combined layers run once per batch tile.
    @pl.when(t == pl.num_programs(1) - 1)
    def _():
        after = jnp.maximum(
            jnp.dot(h_new, w_after_ref[...], preferred_element_type=jnp.float32)
            + b_after_ref[...], 0.0)
        cur = jnp.maximum(
            jnp.dot(oa_ref[...], w_cur_ref[...], preferred_element_type=jnp.float32)
            + b_cur_ref[...], 0.0)
        # cat([after, cur]) @ W_pc1  ==  after @ W_pc1[:H] + cur @ W_pc1[H:]
        z = jnp.maximum(
            jnp.dot(after, w_pc1m_ref[...], preferred_element_type=jnp.float32)
            + jnp.dot(cur, w_pc1c_ref[...], preferred_element_type=jnp.float32)
            + b_pc1_ref[...], 0.0)
        o_ref[...] = (jnp.dot(z, w_pc2_ref[...], preferred_element_type=jnp.float32)
                      + b_pc2_ref[...])


def _round_up(n, m):
    return ((n + m - 1) // m) * m


def _pick_batch_tile(batch):
    for tb in (512, 256, 128, 64, 32, 16, 8):
        if batch % tb == 0:
            return tb
    raise ValueError("batch must be a multiple of 8")


def model_lstm_forward(obs, act, hist_obs, hist_act, params):
    """obs: (B, obs_dim)  act: (B, act_dim)  hist_obs: (B, T, obs_dim)
    hist_act: (B, T, act_dim) (unused: hist_with_past_act=False).  Returns (B,)."""
    del hist_act
    B, T, obs_dim = hist_obs.shape
    act_dim = act.shape[-1]
    oa_dim = obs_dim + act_dim
    obs_pad = _round_up(obs_dim, 128)
    oa_pad = _round_up(oa_dim, 128)
    TB = _pick_batch_tile(B)
    f32 = jnp.float32

    # Time-major history so the streamed block is (TB, obs_pad) — sublane/lane
    # aligned; zero-pad narrow feature dims (matching zero rows in the weights).
    hist_p = jnp.transpose(hist_obs.astype(f32), (1, 0, 2))
    hist_p = jnp.pad(hist_p, ((0, 0), (0, 0), (0, obs_pad - obs_dim)))
    oa = jnp.concatenate([obs, act], axis=-1).astype(f32)
    oa = jnp.pad(oa, ((0, 0), (0, oa_pad - oa_dim)))

    w_pre = jnp.pad(params["w_pre"], ((0, obs_pad - obs_dim), (0, 0)))
    w_cur = jnp.pad(params["w_cur"], ((0, oa_pad - oa_dim), (0, 0)))
    w_pc1m = params["w_pc1"][:HID, :]
    w_pc1c = params["w_pc1"][HID:, :]
    w_pc2 = jnp.pad(params["w_pc2"], ((0, 0), (0, OUT_PAD - params["w_pc2"].shape[1])))
    b_pc2 = jnp.pad(params["b_pc2"], ((0, 0), (0, OUT_PAD - params["b_pc2"].shape[1])))

    w_spec = lambda shape: pl.BlockSpec(shape, lambda b, t: (0, 0))

    out = pl.pallas_call(
        _lstm_q_kernel,
        out_shape=jax.ShapeDtypeStruct((B, OUT_PAD), f32),
        grid=(B // TB, T),
        in_specs=[
            pl.BlockSpec((1, TB, obs_pad), lambda b, t: (t, b, 0)),    # history slice
            pl.BlockSpec((TB, oa_pad), lambda b, t: (b, 0)),           # cat(obs, act)
            w_spec((obs_pad, HID)), w_spec((1, HID)),                  # mem_pre_lstm
            w_spec((HID, GATES)), w_spec((HID, GATES)), w_spec((1, GATES)),  # LSTM
            w_spec((HID, HID)), w_spec((1, HID)),                      # mem_after_lstm
            w_spec((oa_pad, HID)), w_spec((1, HID)),                   # cur_feature
            w_spec((HID, HID)), w_spec((HID, HID)), w_spec((1, HID)),  # post_comb L1
            w_spec((HID, OUT_PAD)), w_spec((1, OUT_PAD)),              # post_comb L2
        ],
        out_specs=pl.BlockSpec((TB, OUT_PAD), lambda b, t: (b, 0)),
        scratch_shapes=[pltpu.VMEM((TB, HID), f32),   # h state
                        pltpu.VMEM((TB, HID), f32)],  # c state
        compiler_params=pltpu.CompilerParams(
            dimension_semantics=("parallel", "arbitrary"),
            vmem_limit_bytes=32 * 1024 * 1024),
    )(hist_p, oa,
      w_pre, params["b_pre"],
      params["w_ih"], params["w_hh"], params["b_lstm"],
      params["w_after"], params["b_after"],
      w_cur, params["b_cur"],
      w_pc1m, w_pc1c, params["b_pc1"],
      w_pc2, b_pc2)
    return out[:, 0]


def init_params(key, obs_dim, act_dim, hidden=HID):
    """Mirror PyTorch default inits (U(-1/sqrt(fan_in), 1/sqrt(fan_in)) for
    Linear; U(-1/sqrt(hidden), 1/sqrt(hidden)) for LSTM). Last layer left
    random so the final matmul path is actually exercised."""
    ks = jax.random.split(key, 14)
    f32 = jnp.float32

    def lin(kw, kb, fan_in, fan_out):
        bound = 1.0 / (fan_in ** 0.5)
        w = jax.random.uniform(kw, (fan_in, fan_out), f32, -bound, bound)
        b = jax.random.uniform(kb, (1, fan_out), f32, -bound, bound)
        return w, b

    w_pre, b_pre = lin(ks[0], ks[1], obs_dim, hidden)
    s = 1.0 / (hidden ** 0.5)
    w_ih = jax.random.uniform(ks[2], (hidden, 4 * hidden), f32, -s, s)
    w_hh = jax.random.uniform(ks[3], (hidden, 4 * hidden), f32, -s, s)
    b_ih = jax.random.uniform(ks[4], (1, 4 * hidden), f32, -s, s)
    b_hh = jax.random.uniform(ks[5], (1, 4 * hidden), f32, -s, s)
    w_after, b_after = lin(ks[6], ks[7], hidden, hidden)
    w_cur, b_cur = lin(ks[8], ks[9], obs_dim + act_dim, hidden)
    w_pc1, b_pc1 = lin(ks[10], ks[11], 2 * hidden, hidden)
    w_pc2, b_pc2 = lin(ks[12], ks[13], hidden, 1)
    return dict(w_pre=w_pre, b_pre=b_pre, w_ih=w_ih, w_hh=w_hh,
                b_lstm=b_ih + b_hh, w_after=w_after, b_after=b_after,
                w_cur=w_cur, b_cur=b_cur, w_pc1=w_pc1, b_pc1=b_pc1,
                w_pc2=w_pc2, b_pc2=b_pc2)


def reference_forward(obs, act, hist_obs, hist_act, p):
    """Pure-JAX reference matching the PyTorch forward (hist_with_past_act=False)."""
    del hist_act
    x = jnp.maximum(hist_obs @ p["w_pre"] + p["b_pre"], 0.0)          # (B, T, H)
    B, T, H = x.shape

    def step(carry, x_t):
        h, c = carry
        gates = x_t @ p["w_ih"] + h @ p["w_hh"] + p["b_lstm"]
        i = jax.nn.sigmoid(gates[:, :H])
        f = jax.nn.sigmoid(gates[:, H:2 * H])
        g = jnp.tanh(gates[:, 2 * H:3 * H])
        o = jax.nn.sigmoid(gates[:, 3 * H:])
        c = f * c + i * g
        h = o * jnp.tanh(c)
        return (h, c), None

    (h, _), _ = jax.lax.scan(step,
                             (jnp.zeros((B, H), x.dtype), jnp.zeros((B, H), x.dtype)),
                             jnp.transpose(x, (1, 0, 2)))
    after = jnp.maximum(h @ p["w_after"] + p["b_after"], 0.0)
    cur = jnp.maximum(jnp.concatenate([obs, act], -1) @ p["w_cur"] + p["b_cur"], 0.0)
    comb = jnp.concatenate([after, cur], -1)
    z = jnp.maximum(comb @ p["w_pc1"] + p["b_pc1"], 0.0)
    out = z @ p["w_pc2"] + p["b_pc2"]
    return out[:, 0]


if __name__ == "__main__":
    key = jax.random.PRNGKey(0)
    k_obs, k_act, k_ho, k_ha, k_p = jax.random.split(key, 5)

    B, T, obs_dim, act_dim = 8, 8, 11, 3
    obs = jax.random.normal(k_obs, (B, obs_dim), jnp.float32)
    act = jax.random.normal(k_act, (B, act_dim), jnp.float32)
    hist_obs = jax.random.normal(k_ho, (B, T, obs_dim), jnp.float32)
    hist_act = jax.random.normal(k_ha, (B, T, act_dim), jnp.float32)
    params = init_params(k_p, obs_dim, act_dim)

    out = model_lstm_forward(obs, act, hist_obs, hist_act, params)
    out = jax.block_until_ready(out)

    ref = reference_forward(obs, act, hist_obs, hist_act, params)
    assert out.shape == (B,)
    assert jnp.allclose(out, ref, atol=1e-4, rtol=1e-4), (
        f"max abs err {float(jnp.max(jnp.abs(out - ref)))}")
    print("KERNEL_OK")
</pallas_src>

<mosaic_0001>
module attributes {stable_mosaic.version = 11 : i64} {
  func.func @_lstm_q_kernel(%arg0: i32, %arg1: i32, %arg2: memref<1x8x128xf32, #tpu.memory_space<vmem>>, %arg3: memref<8x128xf32, #tpu.memory_space<vmem>>, %arg4: memref<128x128xf32, #tpu.memory_space<vmem>>, %arg5: memref<1x128xf32, #tpu.memory_space<vmem>>, %arg6: memref<128x512xf32, #tpu.memory_space<vmem>>, %arg7: memref<128x512xf32, #tpu.memory_space<vmem>>, %arg8: memref<1x512xf32, #tpu.memory_space<vmem>>, %arg9: memref<128x128xf32, #tpu.memory_space<vmem>>, %arg10: memref<1x128xf32, #tpu.memory_space<vmem>>, %arg11: memref<128x128xf32, #tpu.memory_space<vmem>>, %arg12: memref<1x128xf32, #tpu.memory_space<vmem>>, %arg13: memref<128x128xf32, #tpu.memory_space<vmem>>, %arg14: memref<128x128xf32, #tpu.memory_space<vmem>>, %arg15: memref<1x128xf32, #tpu.memory_space<vmem>>, %arg16: memref<128x128xf32, #tpu.memory_space<vmem>>, %arg17: memref<1x128xf32, #tpu.memory_space<vmem>>, %arg18: memref<8x128xf32, #tpu.memory_space<vmem>>, %arg19: memref<8x128xf32, #tpu.memory_space<vmem>>, %arg20: memref<8x128xf32, #tpu.memory_space<vmem>>) attributes {dimension_semantics = [#tpu.dimension_semantics<parallel>, #tpu.dimension_semantics<arbitrary>], iteration_bounds = array<i64: 1, 8>, scalar_prefetch = 0 : i64, scratch_operands = 2 : i64, tpu.core_type = #tpu.core_type<tc>, window_params = [{transform_indices = @transform_0, window_bounds = array<i64: 1, 8, 128>}, {transform_indices = @transform_1, window_bounds = array<i64: 8, 128>}, {pipeline_mode = #tpu.pipeline_mode<synchronous>, transform_indices = @transform_2, window_bounds = array<i64: 128, 128>}, {pipeline_mode = #tpu.pipeline_mode<synchronous>, transform_indices = @transform_3, window_bounds = array<i64: 1, 128>}, {pipeline_mode = #tpu.pipeline_mode<synchronous>, transform_indices = @transform_4, window_bounds = array<i64: 128, 512>}, {pipeline_mode = #tpu.pipeline_mode<synchronous>, transform_indices = @transform_5, window_bounds = array<i64: 128, 512>}, {pipeline_mode = #tpu.pipeline_mode<synchronous>, transform_indices = @transform_6, window_bounds = array<i64: 1, 512>}, {pipeline_mode = #tpu.pipeline_mode<synchronous>, transform_indices = @transform_7, window_bounds = array<i64: 128, 128>}, {pipeline_mode = #tpu.pipeline_mode<synchronous>, transform_indices = @transform_8, window_bounds = array<i64: 1, 128>}, {pipeline_mode = #tpu.pipeline_mode<synchronous>, transform_indices = @transform_9, window_bounds = array<i64: 128, 128>}, {pipeline_mode = #tpu.pipeline_mode<synchronous>, transform_indices = @transform_10, window_bounds = array<i64: 1, 128>}, {pipeline_mode = #tpu.pipeline_mode<synchronous>, transform_indices = @transform_11, window_bounds = array<i64: 128, 128>}, {pipeline_mode = #tpu.pipeline_mode<synchronous>, transform_indices = @transform_12, window_bounds = array<i64: 128, 128>}, {pipeline_mode = #tpu.pipeline_mode<synchronous>, transform_indices = @transform_13, window_bounds = array<i64: 1, 128>}, {pipeline_mode = #tpu.pipeline_mode<synchronous>, transform_indices = @transform_14, window_bounds = array<i64: 128, 128>}, {pipeline_mode = #tpu.pipeline_mode<synchronous>, transform_indices = @transform_15, window_bounds = array<i64: 1, 128>}, {transform_indices = @transform_16, window_bounds = array<i64: 8, 128>}]} {
    %c0_i32 = arith.constant 0 : i32
    %0 = arith.cmpi eq, %arg1, %c0_i32 : i32
    %1 = arith.extui %0 : i1 to i32
    %c0_i32_0 = arith.constant 0 : i32
    %2 = arith.cmpi ne, %1, %c0_i32_0 : i32
    scf.if %2 {
      %cst_34 = arith.constant 0.000000e+00 : f32
      %58 = vector.broadcast %cst_34 : f32 to vector<8x128xf32>
      %c0_35 = arith.constant 0 : index
      %c0_36 = arith.constant 0 : index
      %59 = vector.load %arg19[%c0_35, %c0_36] : memref<8x128xf32, #tpu.memory_space<vmem>>, vector<8x128xf32>
      tpu.vector_store %arg19[%c0_35, %c0_36], %58 {strides = array<i32>} : memref<8x128xf32, #tpu.memory_space<vmem>>, vector<8x128xf32>,
      %cst_37 = arith.constant 0.000000e+00 : f32
      %60 = vector.broadcast %cst_37 : f32 to vector<8x128xf32>
      %c0_38 = arith.constant 0 : index
      %c0_39 = arith.constant 0 : index
      %61 = vector.load %arg20[%c0_38, %c0_39] : memref<8x128xf32, #tpu.memory_space<vmem>>, vector<8x128xf32>
      tpu.vector_store %arg20[%c0_38, %c0_39], %60 {strides = array<i32>} : memref<8x128xf32, #tpu.memory_space<vmem>>, vector<8x128xf32>,
    } else {
    }
    %c0 = arith.constant 0 : index
    %c0_1 = arith.constant 0 : index
    %c0_2 = arith.constant 0 : index
    %3 = vector.load %arg2[%c0, %c0_1, %c0_2] : memref<1x8x128xf32, #tpu.memory_space<vmem>>, vector<1x8x128xf32>
    %4 = vector.shape_cast %3 : vector<1x8x128xf32> to vector<8x128xf32>
    %c0_3 = arith.constant 0 : index
    %c0_4 = arith.constant 0 : index
    %5 = vector.load %arg4[%c0_3, %c0_4] : memref<128x128xf32, #tpu.memory_space<vmem>>, vector<128x128xf32>
    %cst = arith.constant dense<0.000000e+00> : vector<8x128xf32>
    %6 = tpu.matmul %4, %5, %cst {dimension_numbers = #tpu.dot_dimension_numbers<[1], [0], [0], [1], [0, 0, 1, 1], [], []>} : vector<8x128xf32>, vector<128x128xf32>, vector<8x128xf32> -> vector<8x128xf32>
    %c0_5 = arith.constant 0 : index
    %c0_6 = arith.constant 0 : index
    %7 = vector.load %arg5[%c0_5, %c0_6] : memref<1x128xf32, #tpu.memory_space<vmem>>, vector<1x128xf32>
    %8 = vector.broadcast %7 : vector<1x128xf32> to vector<8x128xf32>
    %9 = arith.addf %6, %8 : vector<8x128xf32>
    %cst_7 = arith.constant 0.000000e+00 : f32
    %10 = vector.broadcast %cst_7 : f32 to vector<8x128xf32>
    %11 = arith.maximumf %9, %10 : vector<8x128xf32>
    %c0_8 = arith.constant 0 : index
    %c0_9 = arith.constant 0 : index
    %12 = vector.load %arg19[%c0_8, %c0_9] : memref<8x128xf32, #tpu.memory_space<vmem>>, vector<8x128xf32>
    %c0_10 = arith.constant 0 : index
    %c0_11 = arith.constant 0 : index
    %13 = vector.load %arg20[%c0_10, %c0_11] : memref<8x128xf32, #tpu.memory_space<vmem>>, vector<8x128xf32>
    %c0_12 = arith.constant 0 : index
    %c0_13 = arith.constant 0 : index
    %14 = vector.load %arg6[%c0_12, %c0_13] : memref<128x512xf32, #tpu.memory_space<vmem>>, vector<128x512xf32>
    %cst_14 = arith.constant dense<0.000000e+00> : vector<8x512xf32>
    %15 = tpu.matmul %11, %14, %cst_14 {dimension_numbers = #tpu.dot_dimension_numbers<[1], [0], [0], [1], [0, 0, 1, 1], [], []>} : vector<8x128xf32>, vector<128x512xf32>, vector<8x512xf32> -> vector<8x512xf32>
    %c0_15 = arith.constant 0 : index
    %c0_16 = arith.constant 0 : index
    %16 = vector.load %arg7[%c0_15, %c0_16] : memref<128x512xf32, #tpu.memory_space<vmem>>, vector<128x512xf32>
    %cst_17 = arith.constant dense<0.000000e+00> : vector<8x512xf32>
    %17 = tpu.matmul %12, %16, %cst_17 {dimension_numbers = #tpu.dot_dimension_numbers<[1], [0], [0], [1], [0, 0, 1, 1], [], []>} : vector<8x128xf32>, vector<128x512xf32>, vector<8x512xf32> -> vector<8x512xf32>
    %18 = arith.addf %15, %17 : vector<8x512xf32>
    %c0_18 = arith.constant 0 : index
    %c0_19 = arith.constant 0 : index
    %19 = vector.load %arg8[%c0_18, %c0_19] : memref<1x512xf32, #tpu.memory_space<vmem>>, vector<1x512xf32>
    %20 = vector.broadcast %19 : vector<1x512xf32> to vector<8x512xf32>
    %21 = arith.addf %18, %20 : vector<8x512xf32>
    %22 = vector.extract_strided_slice %21 {offsets = [0, 0], sizes = [8, 128], strides = [1, 1]} : vector<8x512xf32> to vector<8x128xf32>
    %cst_20 = arith.constant 0.000000e+00 : f32
    %23 = vector.broadcast %cst_20 : f32 to vector<8x128xf32>
    %24 = arith.subf %23, %22 : vector<8x128xf32>
    %25 = math.exp %24 : vector<8x128xf32>
    %cst_21 = arith.constant 1.000000e+00 : f32
    %26 = vector.broadcast %cst_21 : f32 to vector<8x128xf32>
    %27 = arith.addf %26, %25 : vector<8x128xf32>
    %cst_22 = arith.constant 1.000000e+00 : f32
    %28 = vector.broadcast %cst_22 : f32 to vector<8x128xf32>
    %29 = arith.divf %28, %27 : vector<8x128xf32>
    %30 = vector.extract_strided_slice %21 {offsets = [0, 128], sizes = [8, 128], strides = [1, 1]} : vector<8x512xf32> to vector<8x128xf32>
    %cst_23 = arith.constant 0.000000e+00 : f32
    %31 = vector.broadcast %cst_23 : f32 to vector<8x128xf32>
    %32 = arith.subf %31, %30 : vector<8x128xf32>
    %33 = math.exp %32 : vector<8x128xf32>
    %cst_24 = arith.constant 1.000000e+00 : f32
    %34 = vector.broadcast %cst_24 : f32 to vector<8x128xf32>
    %35 = arith.addf %34, %33 : vector<8x128xf32>
    %cst_25 = arith.constant 1.000000e+00 : f32
    %36 = vector.broadcast %cst_25 : f32 to vector<8x128xf32>
    %37 = arith.divf %36, %35 : vector<8x128xf32>
    %38 = vector.extract_strided_slice %21 {offsets = [0, 256], sizes = [8, 128], strides = [1, 1]} : vector<8x512xf32> to vector<8x128xf32>
    %39 = math.tanh %38 : vector<8x128xf32>
    %40 = vector.extract_strided_slice %21 {offsets = [0, 384], sizes = [8, 128], strides = [1, 1]} : vector<8x512xf32> to vector<8x128xf32>
    %cst_26 = arith.constant 0.000000e+00 : f32
    %41 = vector.broadcast %cst_26 : f32 to vector<8x128xf32>
    %42 = arith.subf %41, %40 : vector<8x128xf32>
    %43 = math.exp %42 : vector<8x128xf32>
    %cst_27 = arith.constant 1.000000e+00 : f32
    %44 = vector.broadcast %cst_27 : f32 to vector<8x128xf32>
    %45 = arith.addf %44, %43 : vector<8x128xf32>
    %cst_28 = arith.constant 1.000000e+00 : f32
    %46 = vector.broadcast %cst_28 : f32 to vector<8x128xf32>
    %47 = arith.divf %46, %45 : vector<8x128xf32>
    %48 = arith.mulf %37, %13 : vector<8x128xf32>
    %49 = arith.mulf %29, %39 : vector<8x128xf32>
    %50 = arith.addf %48, %49 : vector<8x128xf32>
    %51 = math.tanh %50 : vector<8x128xf32>
    %52 = arith.mulf %47, %51 : vector<8x128xf32>
    %c0_29 = arith.constant 0 : index
    %c0_30 = arith.constant 0 : index
    %53 = vector.load %arg19[%c0_29, %c0_30] : memref<8x128xf32, #tpu.memory_space<vmem>>, vector<8x128xf32>
    tpu.vector_store %arg19[%c0_29, %c0_30], %52 {strides = array<i32>} : memref<8x128xf32, #tpu.memory_space<vmem>>, vector<8x128xf32>,
    %c0_31 = arith.constant 0 : index
    %c0_32 = arith.constant 0 : index
    %54 = vector.load %arg20[%c0_31, %c0_32] : memref<8x128xf32, #tpu.memory_space<vmem>>, vector<8x128xf32>
    tpu.vector_store %arg20[%c0_31, %c0_32], %50 {strides = array<i32>} : memref<8x128xf32, #tpu.memory_space<vmem>>, vector<8x128xf32>,
    %c7_i32 = arith.constant 7 : i32
    %55 = arith.cmpi eq, %arg1, %c7_i32 : i32
    %56 = arith.extui %55 : i1 to i32
    %c0_i32_33 = arith.constant 0 : i32
    %57 = arith.cmpi ne, %56, %c0_i32_33 : i32
    scf.if %57 {
      %c0_34 = arith.constant 0 : index
      %c0_35 = arith.constant 0 : index
      %58 = vector.load %arg9[%c0_34, %c0_35] : memref<128x128xf32, #tpu.memory_space<vmem>>, vector<128x128xf32>
      %cst_36 = arith.constant dense<0.000000e+00> : vector<8x128xf32>
      %59 = tpu.matmul %52, %58, %cst_36 {dimension_numbers = #tpu.dot_dimension_numbers<[1], [0], [0], [1], [0, 0, 1, 1], [], []>} : vector<8x128xf32>, vector<128x128xf32>, vector<8x128xf32> -> vector<8x128xf32>
      %c0_37 = arith.constant 0 : index
      %c0_38 = arith.constant 0 : index
      %60 = vector.load %arg10[%c0_37, %c0_38] : memref<1x128xf32, #tpu.memory_space<vmem>>, vector<1x128xf32>
      %61 = vector.broadcast %60 : vector<1x128xf32> to vector<8x128xf32>
      %62 = arith.addf %59, %61 : vector<8x128xf32>
      %cst_39 = arith.constant 0.000000e+00 : f32
      %63 = vector.broadcast %cst_39 : f32 to vector<8x128xf32>
      %64 = arith.maximumf %62, %63 : vector<8x128xf32>
      %c0_40 = arith.constant 0 : index
      %c0_41 = arith.constant 0 : index
      %65 = vector.load %arg3[%c0_40, %c0_41] : memref<8x128xf32, #tpu.memory_space<vmem>>, vector<8x128xf32>
      %c0_42 = arith.constant 0 : index
      %c0_43 = arith.constant 0 : index
      %66 = vector.load %arg11[%c0_42, %c0_43] : memref<128x128xf32, #tpu.memory_space<vmem>>, vector<128x128xf32>
      %cst_44 = arith.constant dense<0.000000e+00> : vector<8x128xf32>
      %67 = tpu.matmul %65, %66, %cst_44 {dimension_numbers = #tpu.dot_dimension_numbers<[1], [0], [0], [1], [0, 0, 1, 1], [], []>} : vector<8x128xf32>, vector<128x128xf32>, vector<8x128xf32> -> vector<8x128xf32>
      %c0_45 = arith.constant 0 : index
      %c0_46 = arith.constant 0 : index
      %68 = vector.load %arg12[%c0_45, %c0_46] : memref<1x128xf32, #tpu.memory_space<vmem>>, vector<1x128xf32>
      %69 = vector.broadcast %68 : vector<1x128xf32> to vector<8x128xf32>
      %70 = arith.addf %67, %69 : vector<8x128xf32>
      %cst_47 = arith.constant 0.000000e+00 : f32
      %71 = vector.broadcast %cst_47 : f32 to vector<8x128xf32>
      %72 = arith.maximumf %70, %71 : vector<8x128xf32>
      %c0_48 = arith.constant 0 : index
      %c0_49 = arith.constant 0 : index
      %73 = vector.load %arg13[%c0_48, %c0_49] : memref<128x128xf32, #tpu.memory_space<vmem>>, vector<128x128xf32>
      %cst_50 = arith.constant dense<0.000000e+00> : vector<8x128xf32>
      %74 = tpu.matmul %64, %73, %cst_50 {dimension_numbers = #tpu.dot_dimension_numbers<[1], [0], [0], [1], [0, 0, 1, 1], [], []>} : vector<8x128xf32>, vector<128x128xf32>, vector<8x128xf32> -> vector<8x128xf32>
      %c0_51 = arith.constant 0 : index
      %c0_52 = arith.constant 0 : index
      %75 = vector.load %arg14[%c0_51, %c0_52] : memref<128x128xf32, #tpu.memory_space<vmem>>, vector<128x128xf32>
      %cst_53 = arith.constant dense<0.000000e+00> : vector<8x128xf32>
      %76 = tpu.matmul %72, %75, %cst_53 {dimension_numbers = #tpu.dot_dimension_numbers<[1], [0], [0], [1], [0, 0, 1, 1], [], []>} : vector<8x128xf32>, vector<128x128xf32>, vector<8x128xf32> -> vector<8x128xf32>
      %77 = arith.addf %74, %76 : vector<8x128xf32>
      %c0_54 = arith.constant 0 : index
      %c0_55 = arith.constant 0 : index
      %78 = vector.load %arg15[%c0_54, %c0_55] : memref<1x128xf32, #tpu.memory_space<vmem>>, vector<1x128xf32>
      %79 = vector.broadcast %78 : vector<1x128xf32> to vector<8x128xf32>
      %80 = arith.addf %77, %79 : vector<8x128xf32>
      %cst_56 = arith.constant 0.000000e+00 : f32
      %81 = vector.broadcast %cst_56 : f32 to vector<8x128xf32>
      %82 = arith.maximumf %80, %81 : vector<8x128xf32>
      %c0_57 = arith.constant 0 : index
      %c0_58 = arith.constant 0 : index
      %83 = vector.load %arg16[%c0_57, %c0_58] : memref<128x128xf32, #tpu.memory_space<vmem>>, vector<128x128xf32>
      %cst_59 = arith.constant dense<0.000000e+00> : vector<8x128xf32>
      %84 = tpu.matmul %82, %83, %cst_59 {dimension_numbers = #tpu.dot_dimension_numbers<[1], [0], [0], [1], [0, 0, 1, 1], [], []>} : vector<8x128xf32>, vector<128x128xf32>, vector<8x128xf32> -> vector<8x128xf32>
      %c0_60 = arith.constant 0 : index
      %c0_61 = arith.constant 0 : index
      %85 = vector.load %arg17[%c0_60, %c0_61] : memref<1x128xf32, #tpu.memory_space<vmem>>, vector<1x128xf32>
      %86 = vector.broadcast %85 : vector<1x128xf32> to vector<8x128xf32>
      %87 = arith.addf %84, %86 : vector<8x128xf32>
      %c0_62 = arith.constant 0 : index
      %c0_63 = arith.constant 0 : index
      %88 = vector.load %arg18[%c0_62, %c0_63] : memref<8x128xf32, #tpu.memory_space<vmem>>, vector<8x128xf32>
      tpu.vector_store %arg18[%c0_62, %c0_63], %87 {strides = array<i32>} : memref<8x128xf32, #tpu.memory_space<vmem>>, vector<8x128xf32>,
    } else {
    }
    return
  }
  func.func @transform_0(%arg0: i32, %arg1: i32) -> (i32, i32, i32) {
    %c0_i32 = arith.constant 0 : i32
    %c0_i32_0 = arith.constant 0 : i32
    return %arg1, %arg0, %c0_i32 : i32, i32, i32
  }
  func.func @transform_1(%arg0: i32, %arg1: i32) -> (i32, i32) {
    %c0_i32 = arith.constant 0 : i32
    %c0_i32_0 = arith.constant 0 : i32
    return %arg0, %c0_i32 : i32, i32
  }
  func.func @transform_2(%arg0: i32, %arg1: i32) -> (i32, i32) {
    %c0_i32 = arith.constant 0 : i32
    %c0_i32_0 = arith.constant 0 : i32
    %c0_i32_1 = arith.constant 0 : i32
    return %c0_i32, %c0_i32_0 : i32, i32
  }
  func.func @transform_3(%arg0: i32, %arg1: i32) -> (i32, i32) {
    %c0_i32 = arith.constant 0 : i32
    %c0_i32_0 = arith.constant 0 : i32
    %c0_i32_1 = arith.constant 0 : i32
    return %c0_i32, %c0_i32_0 : i32, i32
  }
  func.func @transform_4(%arg0: i32, %arg1: i32) -> (i32, i32) {
    %c0_i32 = arith.constant 0 : i32
    %c0_i32_0 = arith.constant 0 : i32
    %c0_i32_1 = arith.constant 0 : i32
    return %c0_i32, %c0_i32_0 : i32, i32
  }
  func.func @transform_5(%arg0: i32, %arg1: i32) -> (i32, i32) {
    %c0_i32 = arith.constant 0 : i32
    %c0_i32_0 = arith.constant 0 : i32
    %c0_i32_1 = arith.constant 0 : i32
    return %c0_i32, %c0_i32_0 : i32, i32
  }
  func.func @transform_6(%arg0: i32, %arg1: i32) -> (i32, i32) {
    %c0_i32 = arith.constant 0 : i32
    %c0_i32_0 = arith.constant 0 : i32
    %c0_i32_1 = arith.constant 0 : i32
    return %c0_i32, %c0_i32_0 : i32, i32
  }
  func.func @transform_7(%arg0: i32, %arg1: i32) -> (i32, i32) {
    %c0_i32 = arith.constant 0 : i32
    %c0_i32_0 = arith.constant 0 : i32
    %c0_i32_1 = arith.constant 0 : i32
    return %c0_i32, %c0_i32_0 : i32, i32
  }
  func.func @transform_8(%arg0: i32, %arg1: i32) -> (i32, i32) {
    %c0_i32 = arith.constant 0 : i32
    %c0_i32_0 = arith.constant 0 : i32
    %c0_i32_1 = arith.constant 0 : i32
    return %c0_i32, %c0_i32_0 : i32, i32
  }
  func.func @transform_9(%arg0: i32, %arg1: i32) -> (i32, i32) {
    %c0_i32 = arith.constant 0 : i32
    %c0_i32_0 = arith.constant 0 : i32
    %c0_i32_1 = arith.constant 0 : i32
    return %c0_i32, %c0_i32_0 : i32, i32
  }
  func.func @transform_10(%arg0: i32, %arg1: i32) -> (i32, i32) {
    %c0_i32 = arith.constant 0 : i32
    %c0_i32_0 = arith.constant 0 : i32
    %c0_i32_1 = arith.constant 0 : i32
    return %c0_i32, %c0_i32_0 : i32, i32
  }
  func.func @transform_11(%arg0: i32, %arg1: i32) -> (i32, i32) {
    %c0_i32 = arith.constant 0 : i32
    %c0_i32_0 = arith.constant 0 : i32
    %c0_i32_1 = arith.constant 0 : i32
    return %c0_i32, %c0_i32_0 : i32, i32
  }
  func.func @transform_12(%arg0: i32, %arg1: i32) -> (i32, i32) {
    %c0_i32 = arith.constant 0 : i32
    %c0_i32_0 = arith.constant 0 : i32
    %c0_i32_1 = arith.constant 0 : i32
    return %c0_i32, %c0_i32_0 : i32, i32
  }
  func.func @transform_13(%arg0: i32, %arg1: i32) -> (i32, i32) {
    %c0_i32 = arith.constant 0 : i32
    %c0_i32_0 = arith.constant 0 : i32
    %c0_i32_1 = arith.constant 0 : i32
    return %c0_i32, %c0_i32_0 : i32, i32
  }
  func.func @transform_14(%arg0: i32, %arg1: i32) -> (i32, i32) {
    %c0_i32 = arith.constant 0 : i32
    %c0_i32_0 = arith.constant 0 : i32
    %c0_i32_1 = arith.constant 0 : i32
    return %c0_i32, %c0_i32_0 : i32, i32
  }
  func.func @transform_15(%arg0: i32, %arg1: i32) -> (i32, i32) {
    %c0_i32 = arith.constant 0 : i32
    %c0_i32_0 = arith.constant 0 : i32
    %c0_i32_1 = arith.constant 0 : i32
    return %c0_i32, %c0_i32_0 : i32, i32
  }
  func.func @transform_16(%arg0: i32, %arg1: i32) -> (i32, i32) {
    %c0_i32 = arith.constant 0 : i32
    %c0_i32_0 = arith.constant 0 : i32
    return %arg0, %c0_i32 : i32, i32
  }
}

</mosaic_0001>

<bundles_post_ra>
// kernel: tpu_custom_call.1
= control target key start
LH: loop header
LB: loop body
LE: loop exit
PB: predicated region body
PF: predicated region fallthrough
CT: control target
= control target key end

     0   :  { %s3675_s0 = inlined_call_operand.hbm [shape: f32[8,8,128], index: 0, kind: input, shape index: {}]   ;;  %s3676_s1 = inlined_call_operand.hbm [shape: f32[8,128], index: 1, kind: input, shape index: {}]   ;;  %s3677_s2 = inlined_call_operand.hbm [shape: f32[128,128], index: 2, kind: input, shape index: {}]   ;;  %s3678_s3 = inlined_call_operand.vmem [shape: f32[1,128], index: 3, kind: input, shape index: {}]   ;;  %s3679_s4 = inlined_call_operand.hbm [shape: f32[128,512], index: 4, kind: input, shape index: {}]   ;;  %s3680_s5 = inlined_call_operand.hbm [shape: f32[128,512], index: 5, kind: input, shape index: {}]   ;;  %s3681_s6 = inlined_call_operand.vmem [shape: f32[1,512], index: 6, kind: input, shape index: {}]   ;;  %s3682_s7 = inlined_call_operand.hbm [shape: f32[128,128], index: 7, kind: input, shape index: {}]   ;;  %s3683_s8 = inlined_call_operand.vmem [shape: f32[1,128], index: 8, kind: input, shape index: {}]   ;;  %s3684_s9 = inlined_call_operand.hbm [shape: f32[128,128], index: 9, kind: input, shape index: {}]   ;;  %s3685_s10 = inlined_call_operand.vmem [shape: f32[1,128], index: 10, kind: input, shape index: {}]   ;;  %s3686_s11 = inlined_call_operand.hbm [shape: f32[128,128], index: 11, kind: input, shape index: {}]   ;;  %s3687_s12 = inlined_call_operand.hbm [shape: f32[128,128], index: 12, kind: input, shape index: {}]   ;;  %s3688_s13 = inlined_call_operand.vmem [shape: f32[1,128], index: 13, kind: input, shape index: {}]   ;;  %s3689_s14 = inlined_call_operand.hbm [shape: f32[128,128], index: 14, kind: input, shape index: {}]   ;;  %s3690_s15 = inlined_call_operand.vmem [shape: f32[1,128], index: 15, kind: input, shape index: {}]   ;;  %s3691_s16 = inlined_call_operand.hbm [shape: f32[8,128], index: 16, kind: output, shape index: {}]  }
   0x1   :  { %3704 = sst [smem:[#allocation30_spill]] %s3675_s0 }
   0x2   :  { %3705 = sst [smem:[#allocation31_spill]] %s3676_s1 }
   0x3   :  { %3706 = sst [smem:[#allocation32_spill]] %s3678_s3 }
   0x4   :  { %3707 = sst [smem:[#allocation33_spill]] %s3681_s6 }
   0x5   :  { %3708 = sst [smem:[#allocation34_spill]] %s3683_s8 }
   0x6   :  { %3709 = sst [smem:[#allocation35_spill]] %s3685_s10 }
   0x7   :  { %3710 = sst [smem:[#allocation36_spill]] %s3688_s13 }
   0x8   :  { %3711 = sst [smem:[#allocation37_spill]] %s3690_s15 }
   0x9   :  { %3712 = sst [smem:[#allocation38_spill]] %s3691_s16 }
   0xa   :  { %21 = vsyncpa [#allocation5], 0 }
   0xb   :  { %23 = vsyncpa [#allocation5 + $0x1], 0 }
   0xc   :  { %24 = vsyncpa [#allocation8], 0 }
   0xd   :  { %25 = vsyncpa [#allocation11], 0 }
   0xe   :  { %26 = vsyncpa [#allocation14], 0 }
   0xf   :  { %27 = vsyncpa [#allocation17], 0 }
  0x10   :  { %28 = vsyncpa [#allocation20], 0 }
  0x11   :  { %29 = vsyncpa [#allocation6], 0  ;;  %s3170_s21 = smov 0   ;;  %s3172_s22 = smov 0  }
  0x12   :  { %s3174_s23 = smov 0   ;;  %s3176_s24 = smov 0  }
  0x13   :  { %s3178_s25 = smov 0   ;;  %s3180_s26 = smov 0  }
  0x14 LB: > { %3713 = sst [smem:[#allocation29_spill]] %s3053_s24  ;;  %s3693_s27 = sadd.s32 4294967295, %s3061_s26   ;;  %s3061_s26 = sphi %s3180_s26, %s35_s26   ;;  %s3057_s25 = sphi %s3178_s25, %s3745_s25   ;;  %s3053_s24 = sphi %s3176_s24, %s3744_s24   ;;  %s3049_s23 = sphi %s3174_s23, %s3743_s23   ;;  %s3045_s22 = sphi %s3172_s22, %s3742_s22   ;;  %s3041_s21 = sphi %s3170_s21, %s3741_s21  }
  0x15   : > { %p1876_p0 = scmp.ge.s32.totalorder %s3061_s26, 1  ;;  %p3204_p1 = scmp.eq.s32.totalorder %s3693_s27, 0 }
  0x16   : > { %p426_p2 = scmp.lt.s32.totalorder %s3061_s26, 9  ;;  %s3063_s30 = smov [#allocation7]  }
  0x17   : > { %s3714_s28 = scalar_select %p3204_p1, 1, 0 }
  0x18   : > { %p3209_p3 = pnand %p1876_p0, %p426_p2  ;;  %s441_s0 = sshll.u32 %s3063_s30, 4  ;;  %s442_s0 = int_to_ptr.vmem [resolvable:$true] %s441_s0 }
  0x19   : > { %s3064_s17 = smov [#allocation10]   ;;  %s3717_s1 = sld [smem:[#allocation31_spill]] }
  0x1a   : > { %s3715_s29 = scalar_select %p3209_p3, 1, 0 }
  0x1b   : > { %p2541_p4 = pneg %p3209_p3  ;;  %s467_s18 = sshll.u32 %s3064_s17, 4  ;;  %s3221_s18 = int_to_ptr.vmem [resolvable:$true] %s467_s18 }
  0x1d   : > { %p3217_p5 = pnand %p2541_p4, %p3204_p1 }
  0x1f   : > { %s2679_s16 = scalar_lea.hbm %s3717_s1, 128  ;;  %p3231_p7 = pneg %p3217_p5 }
  0x20   : > { %p2680_p6 = scmp.ne.s32.totalorder %s3717_s1, %s2679_s16  ;;  %p2686_p10 = scmp.lt.u32.totalorder %s2679_s16, %s3717_s1 }
  0x22   : > { %p2682_p8 = pnand %p3231_p7, %p2680_p6 }
  0x24   : > { %p2683_p9 = pneg %p2682_p8 }
  0x26   : > { %p2688_p11 = pnand %p2686_p10, %p2683_p9 }
  0x28   : > { %2691 = shalt.err (!%p2688_p11)
}
  0x29   : > { %s2692_s27 = scalar_lea.vmem %s442_s0, 128  ;;  %p2700_p2 = scmp.lt.s32.totalorder %s442_s0, %s442_s0 }
  0x2a   : > { %p2693_p12 = scmp.ne.s32.totalorder %s442_s0, %s2692_s27  ;;  %p2701_p4 = scmp.lt.s32.totalorder %s2692_s27, %s2692_s27 }
  0x2c   : > { %p2695_p13 = pnand %p2693_p12, %p3231_p7  ;;  %p2702_p3 = por %p2701_p4, %p2700_p2 }
  0x2e   : > { %p2696_p0 = pneg %p2695_p13 }
  0x30   : > { %p2703_p1 = pnand %p2702_p3, %p2696_p0 }
  0x32   : > { %2706 = shalt.err (!%p2703_p1)
}
  0x33   : > { %2544 = dma.hbm_to_vmem [thread:$0]  (!%p3217_p5), %s3717_s1, 128, %s442_s0, [#allocation8]  }
  0x34   : > { %s2707_s20 = scalar_lea.hbm %s3679_s4, 8192 }
  0x35   : > { %p2708_p6 = scmp.ne.s32.totalorder %s3679_s4, %s2707_s20  ;;  %p2714_p1 = scmp.lt.u32.totalorder %s2707_s20, %s3679_s4 }
  0x37   : > { %p2710_p8 = pnand %p2708_p6, %p3231_p7 }
  0x39   : > { %p2711_p9 = pneg %p2710_p8 }
  0x3b   : > { %p2716_p3 = pnand %p2714_p1, %p2711_p9 }
  0x3d   : > { %2719 = shalt.err (!%p2716_p3)
}
  0x3e   : > { %s2720_s0 = scalar_lea.vmem %s3221_s18, 8192  ;;  %p2728_p13 = scmp.lt.s32.totalorder %s3221_s18, %s3221_s18 }
  0x3f   : > { %p2721_p10 = scmp.ne.s32.totalorder %s3221_s18, %s2720_s0  ;;  %p2729_p0 = scmp.lt.s32.totalorder %s2720_s0, %s2720_s0 }
  0x41   : > { %p2723_p11 = pnand %p2721_p10, %p3231_p7  ;;  %p2730_p2 = por %p2729_p0, %p2728_p13 }
  0x43   : > { %p2724_p12 = pneg %p2723_p11 }
  0x45   : > { %p2731_p4 = pnand %p2730_p2, %p2724_p12 }
  0x47   : > { %2734 = shalt.err (!%p2731_p4)
}
  0x48   : > { %s3698_s8 = smov 512   ;;  %s3699_s6 = smov 32  }
  0x49   : > { %2550 = dma.hbm_to_vmem [thread:$0]  (!%p3217_p5), %s3679_s4, 8192, %s3221_s18, [#allocation11], %s3698_s8, %s3698_s8, %s3699_s6  }
  0x4a   : > { %s3067_s10 = smov [#allocation13]   ;;  %s3068_s20 = smov [#allocation16]  }
  0x4b   : > { %s496_s16 = sshll.u32 %s3067_s10, 4  ;;  %s528_s17 = sshll.u32 %s3068_s20, 4  ;;  %s497_s16 = int_to_ptr.vmem [resolvable:$true] %s496_s16  ;;  %s3273_s17 = int_to_ptr.vmem [resolvable:$true] %s528_s17 }
  0x4c   : > { %s2735_s1 = scalar_lea.hbm %s3682_s7, 2048 }
  0x4d   : > { %p2736_p6 = scmp.ne.s32.totalorder %s3682_s7, %s2735_s1  ;;  %p2742_p1 = scmp.lt.u32.totalorder %s2735_s1, %s3682_s7 }
  0x4f   : > { %p2738_p8 = pnand %p2736_p6, %p3231_p7 }
  0x51   : > { %p2739_p9 = pneg %p2738_p8 }
  0x53   : > { %p2744_p3 = pnand %p2742_p1, %p2739_p9 }
  0x55   : > { %2747 = shalt.err (!%p2744_p3)
}
  0x56   : > { %s2748_s15 = scalar_lea.vmem %s497_s16, 2048  ;;  %p2756_p13 = scmp.lt.s32.totalorder %s497_s16, %s497_s16 }
  0x57   : > { %p2749_p10 = scmp.ne.s32.totalorder %s497_s16, %s2748_s15  ;;  %p2757_p0 = scmp.lt.s32.totalorder %s2748_s15, %s2748_s15 }
  0x59   : > { %p2751_p11 = pnand %p2749_p10, %p3231_p7  ;;  %p2758_p2 = por %p2757_p0, %p2756_p13 }
  0x5b   : > { %p2752_p12 = pneg %p2751_p11 }
  0x5d   : > { %p2759_p4 = pnand %p2758_p2, %p2752_p12 }
  0x5f   : > { %2762 = shalt.err (!%p2759_p4)
}
  0x60   : > { %s3700_s3 = smov 128   ;;  %s3702_s24 = smov 8  }
  0x61   : > { %2556 = dma.hbm_to_vmem [thread:$0]  (!%p3217_p5), %s3682_s7, 2048, %s497_s16, [#allocation14], %s3700_s3, %s3700_s3, %s3702_s24  }
  0x62   : > { %s2763_s0 = scalar_lea.hbm %s3686_s11, 2048 }
  0x63   : > { %p2764_p6 = scmp.ne.s32.totalorder %s3686_s11, %s2763_s0  ;;  %p2770_p1 = scmp.lt.u32.totalorder %s2763_s0, %s3686_s11 }
  0x65   : > { %p2766_p8 = pnand %p2764_p6, %p3231_p7 }
  0x67   : > { %p2767_p9 = pneg %p2766_p8 }
  0x69   : > { %p2772_p3 = pnand %p2770_p1, %p2767_p9 }
  0x6b   : > { %2775 = shalt.err (!%p2772_p3)
}
  0x6c   : > { %s2776_s16 = scalar_lea.vmem %s3273_s17, 2048  ;;  %p2784_p13 = scmp.lt.s32.totalorder %s3273_s17, %s3273_s17 }
  0x6d   : > { %p2777_p10 = scmp.ne.s32.totalorder %s3273_s17, %s2776_s16  ;;  %p2785_p0 = scmp.lt.s32.totalorder %s2776_s16, %s2776_s16 }
  0x6f   : > { %p2779_p11 = pnand %p2777_p10, %p3231_p7  ;;  %p2786_p2 = por %p2785_p0, %p2784_p13 }
  0x71   : > { %p2780_p12 = pneg %p2779_p11 }
  0x73   : > { %p2787_p4 = pnand %p2786_p2, %p2780_p12 }
  0x75   : > { %2790 = shalt.err (!%p2787_p4)
}
  0x76   : > { %2562 = dma.hbm_to_vmem [thread:$0]  (!%p3217_p5), %s3686_s11, 2048, %s3273_s17, [#allocation17], %s3700_s3, %s3700_s3, %s3702_s24  }
  0x77   : > { %s3071_s10 = smov [#allocation9]   ;;  %s3072_s27 = smov [#allocation12]  }
  0x78   : > { %s451_s20 = sshll.u32 %s3071_s10, 4  ;;  %s480_s0 = sshll.u32 %s3072_s27, 4  ;;  %s452_s20 = int_to_ptr.vmem [resolvable:$true] %s451_s20  ;;  %s3322_s0 = int_to_ptr.vmem [resolvable:$true] %s480_s0 }
  0x79   : > { %s2791_s15 = scalar_lea.hbm %s3677_s2, 2048 }
  0x7a   : > { %p2792_p6 = scmp.ne.s32.totalorder %s3677_s2, %s2791_s15  ;;  %p2798_p1 = scmp.lt.u32.totalorder %s2791_s15, %s3677_s2 }
  0x7c   : > { %p2794_p8 = pnand %p2792_p6, %p3231_p7 }
  0x7e   : > { %p2795_p9 = pneg %p2794_p8 }
  0x80   : > { %p2800_p3 = pnand %p2798_p1, %p2795_p9 }
  0x82   : > { %2803 = shalt.err (!%p2800_p3)
}
  0x83   : > { %s2804_s1 = scalar_lea.vmem %s452_s20, 2048  ;;  %p2812_p13 = scmp.lt.s32.totalorder %s452_s20, %s452_s20 }
  0x84   : > { %p2805_p10 = scmp.ne.s32.totalorder %s452_s20, %s2804_s1  ;;  %p2813_p0 = scmp.lt.s32.totalorder %s2804_s1, %s2804_s1 }
  0x86   : > { %p2807_p11 = pnand %p2805_p10, %p3231_p7  ;;  %p2814_p2 = por %p2813_p0, %p2812_p13 }
  0x88   : > { %p2808_p12 = pneg %p2807_p11 }
  0x8a   : > { %p2815_p4 = pnand %p2814_p2, %p2808_p12 }
  0x8c   : > { %2818 = shalt.err (!%p2815_p4)
}
  0x8d   : > { %2547 = dma.hbm_to_vmem [thread:$0]  (!%p3217_p5), %s3677_s2, 2048, %s452_s20, [#allocation8], %s3700_s3, %s3700_s3, %s3702_s24  }
  0x8e   : > { %s2819_s18 = scalar_lea.hbm %s3680_s5, 8192 }
  0x8f   : > { %p2820_p6 = scmp.ne.s32.totalorder %s3680_s5, %s2819_s18  ;;  %p2826_p1 = scmp.lt.u32.totalorder %s2819_s18, %s3680_s5 }
  0x91   : > { %p2822_p8 = pnand %p2820_p6, %p3231_p7 }
  0x93   : > { %p2823_p9 = pneg %p2822_p8 }
  0x95   : > { %p2828_p3 = pnand %p2826_p1, %p2823_p9 }
  0x97   : > { %2831 = shalt.err (!%p2828_p3)
}
  0x98   : > { %s2832_s20 = scalar_lea.vmem %s3322_s0, 8192  ;;  %p2840_p13 = scmp.lt.s32.totalorder %s3322_s0, %s3322_s0 }
  0x99   : > { %p2833_p10 = scmp.ne.s32.totalorder %s3322_s0, %s2832_s20  ;;  %p2841_p0 = scmp.lt.s32.totalorder %s2832_s20, %s2832_s20 }
  0x9b   : > { %p2835_p11 = pnand %p2833_p10, %p3231_p7  ;;  %p2842_p2 = por %p2841_p0, %p2840_p13 }
  0x9d   : > { %p2836_p12 = pneg %p2835_p11 }
  0x9f   : > { %p2843_p4 = pnand %p2842_p2, %p2836_p12 }
  0xa1   : > { %2846 = shalt.err (!%p2843_p4)
}
  0xa2   : > { %s3719_s1 = smov 32   ;;  %s3720_s6 = smov 512  }
  0xa3   : > { %2553 = dma.hbm_to_vmem [thread:$0]  (!%p3217_p5), %s3680_s5, 8192, %s3322_s0, [#allocation11], %s3720_s6, %s3720_s6, %s3719_s1  }
  0xa4   : > { %s3073_s13 = smov [#allocation15]   ;;  %s3074_s15 = smov [#allocation18]  }
  0xa5   : > { %s512_s18 = sshll.u32 %s3073_s13, 4  ;;  %s541_s16 = sshll.u32 %s3074_s15, 4  ;;  %s513_s18 = int_to_ptr.vmem [resolvable:$true] %s512_s18  ;;  %s3371_s16 = int_to_ptr.vmem [resolvable:$true] %s541_s16 }
  0xa6   : > { %s2847_s20 = scalar_lea.hbm %s3684_s9, 2048 }
  0xa7   : > { %p2848_p6 = scmp.ne.s32.totalorder %s3684_s9, %s2847_s20  ;;  %p2854_p1 = scmp.lt.u32.totalorder %s2847_s20, %s3684_s9 }
  0xa9   : > { %p2850_p8 = pnand %p2848_p6, %p3231_p7 }
  0xab   : > { %p2851_p9 = pneg %p2850_p8 }
  0xad   : > { %p2856_p3 = pnand %p2854_p1, %p2851_p9 }
  0xaf   : > { %2859 = shalt.err (!%p2856_p3)
}
  0xb0   : > { %s2860_s1 = scalar_lea.vmem %s513_s18, 2048  ;;  %p2868_p13 = scmp.lt.s32.totalorder %s513_s18, %s513_s18 }
  0xb1   : > { %p2861_p10 = scmp.ne.s32.totalorder %s513_s18, %s2860_s1  ;;  %p2869_p0 = scmp.lt.s32.totalorder %s2860_s1, %s2860_s1 }
  0xb3   : > { %p2863_p11 = pnand %p2861_p10, %p3231_p7  ;;  %p2870_p2 = por %p2869_p0, %p2868_p13 }
  0xb5   : > { %p2864_p12 = pneg %p2863_p11 }
  0xb7   : > { %p2871_p4 = pnand %p2870_p2, %p2864_p12 }
  0xb9   : > { %2874 = shalt.err (!%p2871_p4)
}
  0xba   : > { %s3721_s3 = smov 8   ;;  %s3722_s24 = smov 128  }
  0xbb   : > { %2559 = dma.hbm_to_vmem [thread:$0]  (!%p3217_p5), %s3684_s9, 2048, %s513_s18, [#allocation14], %s3722_s24, %s3722_s24, %s3721_s3  }
  0xbc   : > { %s2875_s8 = scalar_lea.hbm %s3687_s12, 2048 }
  0xbd   : > { %p2876_p6 = scmp.ne.s32.totalorder %s3687_s12, %s2875_s8  ;;  %p2882_p1 = scmp.lt.u32.totalorder %s2875_s8, %s3687_s12 }
  0xbf   : > { %p2878_p8 = pnand %p2876_p6, %p3231_p7 }
  0xc1   : > { %p2879_p9 = pneg %p2878_p8 }
  0xc3   : > { %p2884_p3 = pnand %p2882_p1, %p2879_p9 }
  0xc5   : > { %2887 = shalt.err (!%p2884_p3)
}
  0xc6   : > { %s2888_s18 = scalar_lea.vmem %s3371_s16, 2048  ;;  %p2896_p13 = scmp.lt.s32.totalorder %s3371_s16, %s3371_s16 }
  0xc7   : > { %p2889_p10 = scmp.ne.s32.totalorder %s3371_s16, %s2888_s18  ;;  %p2897_p0 = scmp.lt.s32.totalorder %s2888_s18, %s2888_s18 }
  0xc9   : > { %p2891_p11 = pnand %p2889_p10, %p3231_p7  ;;  %p2898_p2 = por %p2897_p0, %p2896_p13 }
  0xcb   : > { %p2892_p12 = pneg %p2891_p11 }
  0xcd   : > { %p2899_p4 = pnand %p2898_p2, %p2892_p12 }
  0xcf   : > { %2902 = shalt.err (!%p2899_p4)
}
  0xd0   : > { %2565 = dma.hbm_to_vmem [thread:$0]  (!%p3217_p5), %s3687_s12, 2048, %s3371_s16, [#allocation17], %s3722_s24, %s3722_s24, %s3721_s3  }
  0xd1   : > { %s3075_s27 = smov [#allocation19]   ;;  %s2903_s17 = scalar_lea.hbm %s3689_s14, 2048 }
  0xd2   : > { %s557_s13 = sshll.u32 %s3075_s27, 4  ;;  %p2904_p6 = scmp.ne.s32.totalorder %s3689_s14, %s2903_s17  ;;  %s558_s13 = int_to_ptr.vmem [resolvable:$true] %s557_s13 }
  0xd3   : > { %p2910_p1 = scmp.lt.u32.totalorder %s2903_s17, %s3689_s14 }
  0xd4   : > { %p2906_p8 = pnand %p2904_p6, %p3231_p7 }
  0xd6   : > { %p2907_p9 = pneg %p2906_p8 }
  0xd8   : > { %p2912_p3 = pnand %p2910_p1, %p2907_p9 }
  0xda   : > { %2915 = shalt.err (!%p2912_p3)
}
  0xdb   : > { %s2916_s16 = scalar_lea.vmem %s558_s13, 2048  ;;  %p2924_p13 = scmp.lt.s32.totalorder %s558_s13, %s558_s13 }
  0xdc   : > { %p2917_p10 = scmp.ne.s32.totalorder %s558_s13, %s2916_s16  ;;  %p2925_p0 = scmp.lt.s32.totalorder %s2916_s16, %s2916_s16 }
  0xde   : > { %p2919_p11 = pnand %p2917_p10, %p3231_p7  ;;  %p2926_p2 = por %p2925_p0, %p2924_p13 }
  0xe0   : > { %p2920_p12 = pneg %p2919_p11 }
  0xe2   : > { %p2927_p4 = pnand %p2926_p2, %p2920_p12 }
  0xe4   : > { %2930 = shalt.err (!%p2927_p4)
}
  0xe5   : > { %2568 = dma.hbm_to_vmem [thread:$0]  (!%p3217_p5), %s3689_s14, 2048, %s558_s13, [#allocation20], %s3722_s24, %s3722_s24, %s3721_s3  }
  0xe6   : > { %s44_s19 = sadd.s32 1, %s3057_s25  ;;  %s56_s30 = sadd.s32 1, %s3049_s23 }
  0xe7   : > { %p45_p7 = scmp.ge.s32.totalorder %s44_s19, 8  ;;  %p63_p6 = scmp.ne.s32.totalorder %s3049_s23, %s3045_s22 }
  0xe8   : > { %p64_p8 = scmp.eq.s32.totalorder %s3061_s26, 0  ;;  %p69_p1 = scmp.ne.s32.totalorder %s3045_s22, %s3041_s21 }
  0xe9   : > { %s3747_s19 = smov (%p45_p7, %s44_s19), 0  ;;  %p2582_p3 = scmp.lt.s32.totalorder %s3061_s26, 8 }
  0xea   : > { %p3448_p9 = por %p64_p8, %p63_p6  ;;  %s51_s15 = ssub.s32 %s3057_s25, %s3747_s19 }
  0xeb   : > { %p54_p10 = scmp.eq.s32.totalorder %s51_s15, 0  ;;  %p3724_p11 = scmp.ne.s32.totalorder %s3714_s28, 0 }
  0xec   : > { %s574_s24 = sand.u32 1, %s3049_s23   ;;  %s1888_s13 = sshll.u32 %s3057_s25, 7 }
  0xed   : > { %p3459_p12 = por %p3724_p11, %p69_p1  ;;  %s1887_s17 = sshll.u32 %s574_s24, 3 }
  0xee   : > { %s3466_s8 = scalar_select %p54_p10, %s3049_s23, %s56_s30  }
  0xef   : > { %s3726_s0 = sld [smem:[#allocation30_spill]]  ;;  %s578_s21 = scalar_lea.vmem [#allocation4], %s1887_s17 }
  0xf0   : > { %s586_s16 = sshll.u32 %s578_s21, 4  ;;  %p3475_p5 = pnand %p2582_p3, %p3448_p9  ;;  %s3479_s16 = int_to_ptr.vmem [resolvable:$true] %s586_s16 }
  0xf1   : > { %s575_s6 = scalar_lea.sflag [#allocation5], %s574_s24 }
  0xf2   : > { %p2933_p0 = pneg %p3475_p5 }
  0xf5   : > { %s3471_s18 = scalar_lea.hbm %s3726_s0, %s1888_s13  ;;  %s2936_s27 = scalar_lea.hbm %s3726_s0, 1024 }
  0xf6   : > { %s2931_s30 = scalar_lea.hbm %s3471_s18, 128  ;;  %p2937_p7 = scmp.lt.u32.totalorder %s3471_s18, %s3726_s0 }
  0xf7   : > { %p2932_p13 = scmp.ne.s32.totalorder %s3471_s18, %s2931_s30  ;;  %p2938_p6 = scmp.lt.u32.totalorder %s2936_s27, %s2931_s30 }
  0xf8   : > { %p2940_p9 = scmp.lt.u32.totalorder %s2931_s30, %s3471_s18 }
  0xf9   : > { %p2934_p2 = pnand %p2933_p0, %p2932_p13  ;;  %p2939_p8 = por %p2938_p6, %p2937_p7 }
  0xfb   : > { %p2935_p4 = pneg %p2934_p2  ;;  %p2941_p1 = por %p2940_p9, %p2939_p8 }
  0xfd   : > { %p2942_p3 = pnand %p2941_p1, %p2935_p4 }
  0xff   : > { %2945 = shalt.err (!%p2942_p3)
}
 0x100   : > { %s2946_s24 = scalar_lea.vmem %s3479_s16, 128  ;;  %s3076_s10 = smov [#allocation4]  }
 0x101   : > { %p2947_p10 = scmp.ne.s32.totalorder %s3479_s16, %s2946_s24  ;;  %s2951_s21 = sshll.u32 %s3076_s10, 4  ;;  %s2952_s21 = int_to_ptr.vmem [resolvable:$false] %s2951_s21 }
 0x102   : > { %s2953_s15 = scalar_lea.vmem %s2952_s21, 256  ;;  %p2954_p2 = scmp.lt.s32.totalorder %s3479_s16, %s2952_s21 }
 0x103   : > { %p2949_p11 = pnand %p2947_p10, %p2933_p0  ;;  %p2955_p7 = scmp.lt.s32.totalorder %s2953_s15, %s2946_s24 }
 0x105   : > { %p2950_p13 = pneg %p2949_p11  ;;  %p2956_p6 = por %p2955_p7, %p2954_p2 }
 0x107   : > { %p2957_p8 = pnand %p2956_p6, %p2950_p13 }
 0x109   : > { %2960 = shalt.err (!%p2957_p8)
}
 0x10a   : > { %2572 = dma.hbm_to_vmem [thread:$0]  (!%p3475_p5), %s3471_s18, 128, %s3479_s16, %s575_s6  }
 0x10b   : > { %p3728_p4 = scmp.ne.s32.totalorder %s3715_s29, 0 }
 0x10c   : > { %s597_s30 = sand.u32 (!%p3728_p4), 1, %s3045_s22  }
 0x10d   : > { %595 = sbr.rel (%p3728_p4) target bundleno = 1493 (0x5d5), region = 84  ;;  %s3509_s13 = sshll.u32 (!%p3728_p4), %s597_s30, 3 }
 0x10e   : > { %s598_s27 = scalar_lea.sflag (!%p3728_p4), [#allocation5], %s597_s30  ;;  %s601_s17 = scalar_lea.vmem (!%p3728_p4), [#allocation4], %s3509_s13 }
 0x114   : > { %3012 = dma.done.wait (%p3459_p12), %s598_s27, 128  }
 0x115   : > { %3014 = vsyncadd (%p3459_p12), %s598_s27, 4294967168  ;;  %p3729_p0 = scmp.ne.s32.totalorder %s3714_s28, 0 }
 0x117   : > { %3016 = dma.done.wait (%p3729_p0), [#allocation8], 2176  }
 0x118   : > { %3018 = vsyncadd (%p3729_p0), [#allocation8], 4294965120 }
 0x119   : > { %3020 = dma.done.wait (%p3729_p0), [#allocation11], 16384  }
 0x11a   : > { %3022 = vsyncadd (%p3729_p0), [#allocation11], 4294950912 }
 0x11b   : > { %3024 = dma.done.wait (%p3729_p0), [#allocation14], 4096  }
 0x11c   : > { %3026 = vsyncadd (%p3729_p0), [#allocation14], 4294963200 }
 0x11d   : > { %3028 = dma.done.wait (%p3729_p0), [#allocation17], 4096  }
 0x11e   : > { %3030 = vsyncadd (%p3729_p0), [#allocation17], 4294963200 }
 0x11f   : > { %3032 = dma.done.wait (%p3729_p0), [#allocation20], 2048  }
 0x120   : > { %3034 = vsyncadd (%p3729_p0), [#allocation20], 4294965248  ;;  %s3730_s29 = sld [smem:[#allocation29_spill]] }
 0x126   : > { %p1900_p12 = scmp.ne.s32.totalorder %s3730_s29, 0 }
 0x127   : > { %v3077_v0 = vmov (!%p1900_p12), 0.0  }
 0x128   : > { %684 = sbr.rel (%p1900_p12) target bundleno = 303 (0x12f), region = 128  ;;  %685 = vst [vmem:[#allocation2] sm:$0xff] (!%p1900_p12), %v3077_v0  ;;  %686 = vst [vmem:[#allocation3] sm:$0xff] (!%p1900_p12), %v3077_v0 }
 0x12f PF: > { %v688_v1 = vld [vmem:[#allocation9] sm:$0xff]  ;;  %v689_v2 = vld [vmem:[#allocation9 + $0x8] sm:$0xff]  ;;  %v690_v3 = vld [vmem:[#allocation9 + $0x10] sm:$0xff]  ;;  %v3078_v4 = vmov 0.0|0.0   ;;  %vm3079_vm0 = vmmov 0   ;;  %v3080_v7 = vmov 0.0  }
 0x130   : > { %2223 = vmatprep.subr.bf16.mxu0 %v3078_v4  ;;  %v2224_v5 = vpack.c.bf16 %v689_v2, %v688_v1  ;;  %v691_v6 = vld [vmem:[#allocation9 + $0x18] sm:$0xff]  ;;  %2045 = vmatprep.mubr.msk.f32.mxu0 %vm3079_vm0, %v3080_v7  ;;  %v692_v9 = vld [vmem:[#allocation9 + $0x20] sm:$0xff]  ;;  %v693_v10 = vld [vmem:[#allocation9 + $0x28] sm:$0xff]  ;;  %s3731_s18 = sld [smem:[#allocation32_spill]]  ;;  %s3732_s6 = sld [smem:[#allocation33_spill]] }
 0x131   : > { %976 = vmatprep.mubr.f32.mxu1 %v3080_v7  ;;  %v2227_v8 = vpack.c.bf16 %v691_v6, %v690_v3  ;;  %v849_v11 = vld [vmem:[#allocation12 + $0x8] sm:$0xff]  ;;  %v2230_v13 = vpack.c.bf16 %v693_v10, %v692_v9  ;;  %v694_v14 = vld [vmem:[#allocation9 + $0x30] sm:$0xff]  ;;  %v848_v16 = vld [vmem:[#allocation12] sm:$0xff]  ;;  %s3733_s20 = sld [smem:[#allocation29_spill]] }
 0x132   : > { %2225 = vmatpush3.bf16.msra.mxu0 %v2224_v5  ;;  %v853_v12 = vld [vmem:[#allocation12 + $0x28] sm:$0xff]  ;;  %v852_v17 = vld [vmem:[#allocation12 + $0x20] sm:$0xff]  ;;  %v695_v18 = vld [vmem:[#allocation9 + $0x38] sm:$0xff] }
 0x133   : > { %2226 = vmatprep.subr.bf16.mxu0 %v3078_v4  ;;  %v2247_v15 = vpack.c.bf16 %v853_v12, %v849_v11  ;;  %v2249_v19 = vpack.c.bf16 %v852_v17, %v848_v16  ;;  %v857_v20 = vld [vmem:[#allocation12 + $0x48] sm:$0xff]  ;;  %v856_v23 = vld [vmem:[#allocation12 + $0x40] sm:$0xff]  ;;  %v2233_v25 = vpack.c.bf16 %v695_v18, %v694_v14  ;;  %v698_v38 = vld [vmem:[#allocation9 + $0x50] sm:$0xff] }
 0x134   : > { %v861_v21 = vld [vmem:[#allocation12 + $0x68] sm:$0xff]  ;;  %v860_v24 = vld [vmem:[#allocation12 + $0x60] sm:$0xff]  ;;  %v699_v42 = vld [vmem:[#allocation9 + $0x58] sm:$0xff] }
 0x135   : > { %2248 = vmatprep.subr.bf16.mxu1 %v2247_v15  ;;  %v2251_v22 = vpack.c.bf16 %v861_v21, %v857_v20  ;;  %v696_v26 = vld [vmem:[#allocation9 + $0x40] sm:$0xff]  ;;  %v2253_v27 = vpack.c.bf16 %v860_v24, %v856_v23  ;;  %v865_v28 = vld [vmem:[#allocation12 + $0x88] sm:$0xff]  ;;  %v2239_v46 = vpack.c.bf16 %v699_v42, %v698_v38  ;;  %v702_v56 = vld [vmem:[#allocation9 + $0x70] sm:$0xff] }
 0x136   : > { %2228 = vmatpush3.bf16.msra.mxu0 %v2227_v8  ;;  %2250 = vmatpush1.bf16.msra.mxu1 %v2249_v19  ;;  %v869_v29 = vld [vmem:[#allocation12 + $0xa8] sm:$0xff]  ;;  %v864_v32 = vld [vmem:[#allocation12 + $0x80] sm:$0xff]  ;;  %v703_v60 = vld [vmem:[#allocation9 + $0x78] sm:$0xff] }
 0x137   : > { %2229 = vmatprep.subr.bf16.mxu0 %v3078_v4  ;;  %2252 = vmatprep.subr.bf16.mxu1 %v2251_v22  ;;  %v697_v30 = vld [vmem:[#allocation9 + $0x48] sm:$0xff]  ;;  %v2255_v31 = vpack.c.bf16 %v869_v29, %v865_v28  ;;  %v868_v33 = vld [vmem:[#allocation12 + $0xa0] sm:$0xff]  ;;  %v851_v63 = vld [vmem:[#allocation12 + $0x18] sm:$0xff]  ;;  %v2245_v2 = vpack.c.bf16 %v703_v60, %v702_v56  ;;  %p1902_p5 = scmp.ne.s32.totalorder %s3733_s20, 7 }
 0x138   : > { %v873_v34 = vld [vmem:[#allocation12 + $0xc8] sm:$0xff]  ;;  %v2257_v35 = vpack.c.bf16 %v868_v33, %v864_v32  ;;  %v2236_v37 = vpack.c.bf16 %v697_v30, %v696_v26  ;;  %v872_v40 = vld [vmem:[#allocation12 + $0xc0] sm:$0xff]  ;;  %v855_v0 = vld [vmem:[#allocation12 + $0x38] sm:$0xff]  ;;  %vm3082_vm1 = vmmov (!%p1902_p5), 0   ;;  %s3734_s21 = sld [smem:[#allocation34_spill]] (!%p1902_p5)  ;;  %s3735_s13 = sld [smem:[#allocation35_spill]] (!%p1902_p5) }
 0x139   : > { %v877_v36 = vld [vmem:[#allocation12 + $0xe8] sm:$0xff]  ;;  %v876_v41 = vld [vmem:[#allocation12 + $0xe0] sm:$0xff]  ;;  %v850_v3 = vld [vmem:[#allocation12 + $0x10] sm:$0xff]  ;;  %v2279_v9 = vpack.c.bf16 %v855_v0, %v851_v63  ;;  %s3736_s29 = sld [smem:[#allocation36_spill]] (!%p1902_p5) }
 0x13a   : > { %2231 = vmatpush3.bf16.msra.mxu0 %v2230_v13  ;;  %2254 = vmatpush1.bf16.msra.mxu1 %v2253_v27  ;;  %v2259_v39 = vpack.c.bf16 %v877_v36, %v873_v34  ;;  %v881_v43 = vld [vmem:[#allocation12 + $0x108] sm:$0xff]  ;;  %v2261_v45 = vpack.c.bf16 %v876_v41, %v872_v40  ;;  %v700_v47 = vld [vmem:[#allocation9 + $0x60] sm:$0xff]  ;;  %v854_v10 = vld [vmem:[#allocation12 + $0x30] sm:$0xff] }
 0x13b   : > { %2232 = vmatprep.subr.bf16.mxu0 %v3078_v4  ;;  %2256 = vmatprep.subr.bf16.mxu1 %v2255_v31  ;;  %v885_v44 = vld [vmem:[#allocation12 + $0x128] sm:$0xff]  ;;  %v880_v49 = vld [vmem:[#allocation12 + $0x100] sm:$0xff]  ;;  %v859_v13 = vld [vmem:[#allocation12 + $0x58] sm:$0xff]  ;;  %v2281_v17 = vpack.c.bf16 %v854_v10, %v850_v3 }
 0x13c   : > { %v2263_v48 = vpack.c.bf16 %v885_v44, %v881_v43  ;;  %v884_v50 = vld [vmem:[#allocation12 + $0x120] sm:$0xff]  ;;  %v701_v51 = vld [vmem:[#allocation9 + $0x68] sm:$0xff]  ;;  %v863_v14 = vld [vmem:[#allocation12 + $0x78] sm:$0xff] }
 0x13d   : > { %v889_v52 = vld [vmem:[#allocation12 + $0x148] sm:$0xff]  ;;  %v2265_v54 = vpack.c.bf16 %v884_v50, %v880_v49  ;;  %v2242_v55 = vpack.c.bf16 %v701_v51, %v700_v47  ;;  %v888_v58 = vld [vmem:[#allocation12 + $0x140] sm:$0xff]  ;;  %v858_v18 = vld [vmem:[#allocation12 + $0x50] sm:$0xff]  ;;  %v2283_v22 = vpack.c.bf16 %v863_v14, %v859_v13 }
 0x13e   : > { %2234 = vmatpush3.bf16.msra.mxu0 %v2233_v25  ;;  %2258 = vmatpush1.bf16.msra.mxu1 %v2257_v35  ;;  %v893_v53 = vld [vmem:[#allocation12 + $0x168] sm:$0xff]  ;;  %v892_v59 = vld [vmem:[#allocation12 + $0x160] sm:$0xff]  ;;  %v867_v25 = vld [vmem:[#allocation12 + $0x98] sm:$0xff] }
 0x13f   : > { %2235 = vmatprep.subr.bf16.mxu0 %v3078_v4  ;;  %2260 = vmatprep.subr.bf16.mxu1 %v2259_v39  ;;  %v2267_v57 = vpack.c.bf16 %v893_v53, %v889_v52  ;;  %v897_v61 = vld [vmem:[#allocation12 + $0x188] sm:$0xff]  ;;  %v2269_v1 = vpack.c.bf16 %v892_v59, %v888_v58  ;;  %v896_v6 = vld [vmem:[#allocation12 + $0x180] sm:$0xff]  ;;  %v871_v26 = vld [vmem:[#allocation12 + $0xb8] sm:$0xff] }
 0x140   : > { %v901_v62 = vld [vmem:[#allocation12 + $0x1a8] sm:$0xff]  ;;  %v900_v8 = vld [vmem:[#allocation12 + $0x1a0] sm:$0xff]  ;;  %v866_v29 = vld [vmem:[#allocation12 + $0x90] sm:$0xff]  ;;  %v2287_v33 = vpack.c.bf16 %v871_v26, %v867_v25 }
 0x141   : > { %v2271_v5 = vpack.c.bf16 %v901_v62, %v897_v61  ;;  %v905_v11 = vld [vmem:[#allocation12 + $0x1c8] sm:$0xff]  ;;  %v2273_v16 = vpack.c.bf16 %v900_v8, %v896_v6  ;;  %v904_v20 = vld [vmem:[#allocation12 + $0x1c0] sm:$0xff]  ;;  %v870_v34 = vld [vmem:[#allocation12 + $0xb0] sm:$0xff] }
 0x142   : > { %2237 = vmatpush3.bf16.msra.mxu0 %v2236_v37  ;;  %2262 = vmatpush1.bf16.msra.mxu1 %v2261_v45  ;;  %v909_v12 = vld [vmem:[#allocation12 + $0x1e8] sm:$0xff]  ;;  %v908_v21 = vld [vmem:[#allocation12 + $0x1e0] sm:$0xff]  ;;  %v875_v37 = vld [vmem:[#allocation12 + $0xd8] sm:$0xff]  ;;  %v2289_v41 = vpack.c.bf16 %v870_v34, %v866_v29 }
 0x143   : > { %2238 = vmatprep.subr.bf16.mxu0 %v3078_v4  ;;  %2264 = vmatprep.subr.bf16.mxu1 %v2263_v48  ;;  %v687_v15 = vld [vmem:[%s601_s17] sm:$0xff]  ;;  %v2275_v19 = vpack.c.bf16 %v909_v12, %v905_v11  ;;  %v2277_v27 = vpack.c.bf16 %v908_v21, %v904_v20  ;;  %v784_v31 = vld [vmem:[#allocation10] sm:$0xff]  ;;  %v879_v38 = vld [vmem:[#allocation12 + $0xf8] sm:$0xff] }
 0x144   : > { %v785_v23 = vld [vmem:[#allocation10 + $0x8] sm:$0xff]  ;;  %v788_v32 = vld [vmem:[#allocation10 + $0x20] sm:$0xff]  ;;  %v3550_v39 = vld [vmem:[#allocation2] sm:$0xff] }
 0x145   : > { %v789_v24 = vld [vmem:[#allocation10 + $0x28] sm:$0xff]  ;;  %v2313_v40 = vpack.c.bf16 %v788_v32, %v784_v31  ;;  %v874_v42 = vld [vmem:[#allocation12 + $0xd0] sm:$0xff]  ;;  %v792_v44 = vld [vmem:[#allocation10 + $0x40] sm:$0xff] }
 0x146   : > { %2240 = vmatpush3.bf16.msra.mxu0 %v2239_v46  ;;  %2266 = vmatpush1.bf16.msra.mxu1 %v2265_v54  ;;  %v2311_v30 = vpack.c.bf16 %v789_v24, %v785_v23  ;;  %v793_v35 = vld [vmem:[#allocation10 + $0x48] sm:$0xff]  ;;  %v796_v45 = vld [vmem:[#allocation10 + $0x60] sm:$0xff]  ;;  %v2291_v46 = vpack.c.bf16 %v879_v38, %v875_v37  ;;  %v878_v47 = vld [vmem:[#allocation12 + $0xf0] sm:$0xff] }
 0x147   : > { %2241 = vmatprep.subr.bf16.mxu0 %v3078_v4  ;;  %2268 = vmatprep.subr.bf16.mxu1 %v2267_v57  ;;  %v797_v36 = vld [vmem:[#allocation10 + $0x68] sm:$0xff]  ;;  %v883_v50 = vld [vmem:[#allocation12 + $0x118] sm:$0xff]  ;;  %v2317_v52 = vpack.c.bf16 %v796_v45, %v792_v44  ;;  %v2293_v53 = vpack.c.bf16 %v878_v47, %v874_v42  ;;  %v882_v54 = vld [vmem:[#allocation12 + $0x110] sm:$0xff] }
 0x148   : > { %v2315_v43 = vpack.c.bf16 %v797_v36, %v793_v35  ;;  %v801_v48 = vld [vmem:[#allocation10 + $0x88] sm:$0xff]  ;;  %v887_v51 = vld [vmem:[#allocation12 + $0x138] sm:$0xff]  ;;  %v800_v56 = vld [vmem:[#allocation10 + $0x80] sm:$0xff] }
 0x149   : > { %v805_v49 = vld [vmem:[#allocation10 + $0xa8] sm:$0xff]  ;;  %v804_v57 = vld [vmem:[#allocation10 + $0xa0] sm:$0xff]  ;;  %v2295_v58 = vpack.c.bf16 %v887_v51, %v883_v50  ;;  %v886_v59 = vld [vmem:[#allocation12 + $0x130] sm:$0xff] }
 0x14a   : > { %2243 = vmatpush3.bf16.msra.mxu0 %v2242_v55  ;;  %2270 = vmatpush1.bf16.msra.mxu1 %v2269_v1  ;;  %v2319_v55 = vpack.c.bf16 %v805_v49, %v801_v48  ;;  %v809_v60 = vld [vmem:[#allocation10 + $0xc8] sm:$0xff]  ;;  %v891_v62 = vld [vmem:[#allocation12 + $0x158] sm:$0xff]  ;;  %v2321_v0 = vpack.c.bf16 %v804_v57, %v800_v56  ;;  %v2297_v1 = vpack.c.bf16 %v886_v59, %v882_v54  ;;  %v812_v6 = vld [vmem:[#allocation10 + $0xe0] sm:$0xff] }
 0x14b   : > { %2244 = vmatprep.subr.bf16.mxu0 %v3078_v4  ;;  %2272 = vmatprep.subr.bf16.mxu1 %v2271_v5  ;;  %v862_v4 = vld [vmem:[#allocation12 + $0x70] sm:$0xff]  ;;  %v813_v61 = vld [vmem:[#allocation10 + $0xe8] sm:$0xff]  ;;  %v895_v63 = vld [vmem:[#allocation12 + $0x178] sm:$0xff] }
 0x14c   : > { %v2285_v28 = vpack.c.bf16 %v862_v4, %v858_v18  ;;  %v2323_v3 = vpack.c.bf16 %v813_v61, %v809_v60  ;;  %v808_v5 = vld [vmem:[#allocation10 + $0xc0] sm:$0xff]  ;;  %v2299_v8 = vpack.c.bf16 %v895_v63, %v891_v62  ;;  %v817_v10 = vld [vmem:[#allocation10 + $0x108] sm:$0xff]  ;;  %v899_v12 = vld [vmem:[#allocation12 + $0x198] sm:$0xff] }
 0x14d   : > { %v821_v11 = vld [vmem:[#allocation10 + $0x128] sm:$0xff]  ;;  %v903_v13 = vld [vmem:[#allocation12 + $0x1b8] sm:$0xff]  ;;  %v2325_v14 = vpack.c.bf16 %v812_v6, %v808_v5  ;;  %v816_v18 = vld [vmem:[#allocation10 + $0x100] sm:$0xff] }
 0x14e   : > { %2246 = vmatpush3.bf16.msra.mxu0 %v2245_v2  ;;  %2274 = vmatpush1.bf16.msra.mxu1 %v2273_v16  ;;  %v890_v2 = vld [vmem:[#allocation12 + $0x150] sm:$0xff]  ;;  %v2303_v20 = vpack.c.bf16 %v903_v13, %v899_v12  ;;  %v829_v4 = vld [vmem:[#allocation10 + $0x168] sm:$0xff]  ;;  %v907_v23 = vld [vmem:[#allocation12 + $0x1d8] sm:$0xff] }
 0x14f   : > { %2280 = vmatprep.subr.bf16.mxu0 %v2279_v9  ;;  %2276 = vmatprep.subr.bf16.mxu1 %v2275_v19  ;;  %v894_v9 = vld [vmem:[#allocation12 + $0x170] sm:$0xff]  ;;  %v820_v19 = vld [vmem:[#allocation10 + $0x120] sm:$0xff]  ;;  %v911_v24 = vld [vmem:[#allocation12 + $0x1f8] sm:$0xff] }
 0x150   : > { %v898_v16 = vld [vmem:[#allocation12 + $0x190] sm:$0xff]  ;;  %v2329_v25 = vpack.c.bf16 %v820_v19, %v816_v18  ;;  %v824_v29 = vld [vmem:[#allocation10 + $0x140] sm:$0xff]  ;;  %v2307_v31 = vpack.c.bf16 %v911_v24, %v907_v23  ;;  %v837_v34 = vld [vmem:[#allocation10 + $0x1a8] sm:$0xff] }
 0x151   : > { %2046 = vmatmul.mubr.f32.vlgmr.msra.gmra.mrb[0].mxu0 %v687_v15  ;;  %v2301_v15 = vpack.c.bf16 %v894_v9, %v890_v2  ;;  %v902_v21 = vld [vmem:[#allocation12 + $0x1b0] sm:$0xff]  ;;  %v787_v35 = vld [vmem:[#allocation10 + $0x18] sm:$0xff]  ;;  %v836_v42 = vld [vmem:[#allocation10 + $0x1a0] sm:$0xff] }
 0x152   : > { %2282 = vmatpush1.bf16.msra.mxu0 %v2281_v17  ;;  %1047 = vmatprep.mubr.f32.mxu0 %v3080_v7  ;;  %v2327_v17 = vpack.c.bf16 %v821_v11, %v817_v10  ;;  %v2305_v26 = vpack.c.bf16 %v902_v21, %v898_v16  ;;  %v910_v32 = vld [vmem:[#allocation12 + $0x1f0] sm:$0xff]  ;;  %v791_v36 = vld [vmem:[#allocation10 + $0x38] sm:$0xff]  ;;  %v845_v21 = vld [vmem:[#allocation10 + $0x1e8] sm:$0xff] }
 0x153   : > { %2284 = vmatprep.subr.bf16.mxu0 %v2283_v22  ;;  %2278 = vmatpush1.bf16.msra.mxu1 %v2277_v27  ;;  %v825_v22 = vld [vmem:[#allocation10 + $0x148] sm:$0xff]  ;;  %v906_v27 = vld [vmem:[#allocation12 + $0x1d0] sm:$0xff]  ;;  %v799_v47 = vld [vmem:[#allocation10 + $0x78] sm:$0xff] }
 0x154   : > { %2312 = vmatprep.subr.bf16.mxu1 %v2311_v30  ;;  %v828_v30 = vld [vmem:[#allocation10 + $0x160] sm:$0xff]  ;;  %v2309_v38 = vpack.c.bf16 %v910_v32, %v906_v27  ;;  %v786_v44 = vld [vmem:[#allocation10 + $0x10] sm:$0xff]  ;;  %v807_v54 = vld [vmem:[#allocation10 + $0xb8] sm:$0xff] }
 0x155   : > { %v2333_v37 = vpack.c.bf16 %v828_v30, %v824_v29  ;;  %v790_v45 = vld [vmem:[#allocation10 + $0x30] sm:$0xff]  ;;  %v811_v59 = vld [vmem:[#allocation10 + $0xd8] sm:$0xff]  ;;  %v840_v24 = vld [vmem:[#allocation10 + $0x1c0] sm:$0xff] }
 0x156   : > { %2286 = vmatpush1.bf16.msra.mxu0 %v2285_v28  ;;  %977 = vmatmul.mubr.f32.vlgmr.msra.gmra.mrb[0].mxu1 %v3550_v39  ;;  %v2331_v28 = vpack.c.bf16 %v829_v4, %v825_v22  ;;  %v2345_v49 = vpack.c.bf16 %v790_v45, %v786_v44  ;;  %v794_v51 = vld [vmem:[#allocation10 + $0x50] sm:$0xff]  ;;  %v815_v60 = vld [vmem:[#allocation10 + $0xf8] sm:$0xff] }
 0x157   : > { %2288 = vmatprep.subr.bf16.mxu0 %v2287_v33  ;;  %2314 = vmatpush1.bf16.msra.mxu1 %v2313_v40  ;;  %v833_v33 = vld [vmem:[#allocation10 + $0x188] sm:$0xff]  ;;  %v802_v57 = vld [vmem:[#allocation10 + $0x90] sm:$0xff]  ;;  %v2355_v62 = vpack.c.bf16 %v815_v60, %v811_v59  ;;  %v823_v2 = vld [vmem:[#allocation10 + $0x138] sm:$0xff] }
 0x158   : > { %1118 = vmatprep.mubr.f32.mxu1 %v3080_v7  ;;  %2316 = vmatprep.subr.bf16.mxu1 %v2315_v43  ;;  %v2335_v40 = vpack.c.bf16 %v837_v34, %v833_v33  ;;  %v2343_v43 = vpack.c.bf16 %v791_v36, %v787_v35  ;;  %v810_v63 = vld [vmem:[#allocation10 + $0xd0] sm:$0xff]  ;;  %v827_v6 = vld [vmem:[#allocation10 + $0x158] sm:$0xff]  ;;  %v1198_v36 = vlaneseq }
 0x159   : > { %v818_v5 = vld [vmem:[#allocation10 + $0x110] sm:$0xff]  ;;  %v835_v13 = vld [vmem:[#allocation10 + $0x198] sm:$0xff] }
 0x15a   : > { %2290 = vmatpush1.bf16.msra.mxu0 %v2289_v41  ;;  %v832_v41 = vld [vmem:[#allocation10 + $0x180] sm:$0xff]  ;;  %v826_v11 = vld [vmem:[#allocation10 + $0x150] sm:$0xff]  ;;  %v843_v22 = vld [vmem:[#allocation10 + $0x1d8] sm:$0xff] }
 0x15b   : > { %2292 = vmatprep.subr.bf16.mxu0 %v2291_v46  ;;  %2318 = vmatpush1.bf16.msra.mxu1 %v2317_v52  ;;  %v795_v46 = vld [vmem:[#allocation10 + $0x58] sm:$0xff]  ;;  %v2337_v48 = vpack.c.bf16 %v836_v42, %v832_v41  ;;  %v798_v52 = vld [vmem:[#allocation10 + $0x70] sm:$0xff] }
 0x15c   : > { %2320 = vmatprep.subr.bf16.mxu1 %v2319_v55  ;;  %v2347_v50 = vpack.c.bf16 %v799_v47, %v795_v46  ;;  %v2349_v55 = vpack.c.bf16 %v798_v52, %v794_v51  ;;  %v830_v12 = vld [vmem:[#allocation10 + $0x170] sm:$0xff]  ;;  %v847_v23 = vld [vmem:[#allocation10 + $0x1f8] sm:$0xff] }
 0x15d   : > { %v838_v18 = vld [vmem:[#allocation10 + $0x1b0] sm:$0xff] }
 0x15e   : > { %2294 = vmatpush1.bf16.msra.mxu0 %v2293_v53  ;;  %v803_v53 = vld [vmem:[#allocation10 + $0x98] sm:$0xff]  ;;  %v846_v29 = vld [vmem:[#allocation10 + $0x1f0] sm:$0xff] }
 0x15f   : > { %2296 = vmatprep.subr.bf16.mxu0 %v2295_v58  ;;  %2322 = vmatpush1.bf16.msra.mxu1 %v2321_v0  ;;  %v2351_v56 = vpack.c.bf16 %v807_v54, %v803_v53  ;;  %v806_v58 = vld [vmem:[#allocation10 + $0xb0] sm:$0xff] }
 0x160   : > { %2324 = vmatprep.subr.bf16.mxu1 %v2323_v3  ;;  %v2353_v61 = vpack.c.bf16 %v806_v58, %v802_v57  ;;  %v814_v0 = vld [vmem:[#allocation10 + $0xf0] sm:$0xff] }
 0x162   : > { %2298 = vmatpush1.bf16.msra.mxu0 %v2297_v1  ;;  %v819_v1 = vld [vmem:[#allocation10 + $0x118] sm:$0xff] }
 0x163   : > { %2300 = vmatprep.subr.bf16.mxu0 %v2299_v8  ;;  %2326 = vmatpush1.bf16.msra.mxu1 %v2325_v14  ;;  %v2359_v3 = vpack.c.bf16 %v823_v2, %v819_v1  ;;  %v831_v8 = vld [vmem:[#allocation10 + $0x178] sm:$0xff] }
 0x164   : > { %2328 = vmatprep.subr.bf16.mxu1 %v2327_v17  ;;  %v2363_v10 = vpack.c.bf16 %v831_v8, %v827_v6  ;;  %v839_v14 = vld [vmem:[#allocation10 + $0x1b8] sm:$0xff]  ;;  %v834_v17 = vld [vmem:[#allocation10 + $0x190] sm:$0xff] }
 0x165   : > { %v2367_v16 = vpack.c.bf16 %v839_v14, %v835_v13  ;;  %v2369_v19 = vpack.c.bf16 %v838_v18, %v834_v17  ;;  %v1252_v14 = vld [vmem:[#allocation13] sm:$0xff] (!%p1902_p5)  ;;  %v3081_v17 = vmov (!%p1902_p5), 0.0|0.0  }
 0x166   : > { %2302 = vmatpush1.bf16.msra.mxu0 %v2301_v15  ;;  %v2365_v15 = vpack.c.bf16 %v830_v12, %v826_v11 }
 0x167   : > { %2304 = vmatprep.subr.bf16.mxu0 %v2303_v20  ;;  %2330 = vmatpush1.bf16.msra.mxu1 %v2329_v25  ;;  %v841_v20 = vld [vmem:[#allocation10 + $0x1c8] sm:$0xff]  ;;  %v844_v25 = vld [vmem:[#allocation10 + $0x1e0] sm:$0xff] }
 0x168   : > { %2332 = vmatprep.subr.bf16.mxu1 %v2331_v28  ;;  %v2339_v4 = vpack.c.bf16 %v845_v21, %v841_v20  ;;  %v2341_v27 = vpack.c.bf16 %v844_v25, %v840_v24  ;;  %v842_v28 = vld [vmem:[#allocation10 + $0x1d0] sm:$0xff]  ;;  %v1255_v21 = vld [vmem:[#allocation13 + $0x18] sm:$0xff] (!%p1902_p5)  ;;  %v3083_v24 = vmov (!%p1902_p5), 0.0  }
 0x169   : > { %v2373_v30 = vpack.c.bf16 %v846_v29, %v842_v28  ;;  %v1254_v20 = vld [vmem:[#allocation13 + $0x10] sm:$0xff] (!%p1902_p5)  ;;  %v1257_v28 = vld [vmem:[#allocation13 + $0x28] sm:$0xff] (!%p1902_p5)  ;;  %v1351_v29 = vld [vmem:[#allocation15 + $0x20] sm:$0xff] (!%p1902_p5) }
 0x16a   : > { %2306 = vmatpush1.bf16.msra.mxu0 %v2305_v26  ;;  %v2371_v26 = vpack.c.bf16 %v847_v23, %v843_v22  ;;  %v1350_v23 = vld [vmem:[#allocation15 + $0x18] sm:$0xff] (!%p1902_p5)  ;;  %v2379_v25 = vpack.c.bf16 (!%p1902_p5), %v1255_v21, %v1254_v20  ;;  %v1463_v20 = vld [vmem:[#allocation18 + $0x30] sm:$0xff] (!%p1902_p5) }
 0x16b   : > { %2308 = vmatprep.subr.bf16.mxu0 %v2307_v31  ;;  %2334 = vmatpush1.bf16.msra.mxu1 %v2333_v37  ;;  %v1901_v31 = vld [vmem:[%s3731_s18] ss:$0 sm:$0xff]  ;;  %v1199_v37 = vshrl.u32 %v1198_v36, 7  ;;  %s3737_s18 = sld [smem:[#allocation37_spill]] (!%p1902_p5) }
 0x16c   : > { %2336 = vmatprep.subr.bf16.mxu1 %v2335_v40  ;;  %v1196_v40 = vld [vmem:[%s3732_s6] sm:$0xf] }
 0x16d   : > { %v1204_v41 = vsub.s32 1, %v1199_v37  ;;  %v1212_v44 = vsub.s32 3, %v1199_v37  ;;  %v1208_v57 = vsub.s32 2, %v1199_v37  ;;  %v1354_v36 = vld [vmem:[#allocation15 + $0x38] sm:$0xff] (!%p1902_p5) }
 0x16e   : > { %2310 = vmatpush1.bf16.msra.mxu0 %v2309_v38  ;;  %v1200_v38 = vsub.s32 0, %v1199_v37  ;;  %v1464_v21 = vld [vmem:[#allocation18 + $0x38] sm:$0xff] (!%p1902_p5) }
 0x16f   : > { %2344 = vmatprep.subr.bf16.mxu0 %v2343_v43  ;;  %2338 = vmatpush1.bf16.msra.mxu1 %v2337_v48  ;;  %v1205_v43 = vrot.slane %v1196_v40, %v1204_v41  ;;  %v1213_v51 = vrot.slane %v1196_v40, %v1212_v44  ;;  %v1209_v59 = vrot.slane %v1196_v40, %v1208_v57  ;;  %v1261_v41 = vld [vmem:[#allocation13 + $0x48] sm:$0xff] (!%p1902_p5) }
 0x170   : > { %2340 = vmatprep.subr.bf16.mxu1 %v2339_v4  ;;  %v1201_v42 = vrot.slane %v1196_v40, %v1200_v38  ;;  %v1349_v4 = vld [vmem:[#allocation15 + $0x10] sm:$0xff] (!%p1902_p5)  ;;  %v1260_v40 = vld [vmem:[#allocation13 + $0x40] sm:$0xff] (!%p1902_p5) }
 0x171   : > { %1048 = vmatmul.mubr.f32.vlgmr.msra.gmra.mrb[2].mxu0 %v3550_v39  ;;  %v2357_v39 = vpack.c.bf16 %v814_v0, %v810_v63  ;;  %v2388_v44 = vpack.c.bf16 (!%p1902_p5), %v1261_v41, %v1260_v40  ;;  %v1470_v40 = vld [vmem:[#allocation18 + $0x68] sm:$0xff] (!%p1902_p5)  ;;  %v1453_v41 = vld [vmem:[#allocation16 + $0x60] sm:$0xff] (!%p1902_p5) }
 0x172   : > { %2346 = vmatpush1.bf16.msra.mxu0 %v2345_v49  ;;  %1189 = vmatprep.mubr.f32.mxu0 %v3080_v7  ;;  %v822_v7 = vld [vmem:[#allocation10 + $0x130] sm:$0xff] }
 0x173   : > { %2348 = vmatprep.subr.bf16.mxu0 %v2347_v50  ;;  %v2361_v9 = vpack.c.bf16 %v822_v7, %v818_v5  ;;  %2342 = vmatpush1.bf16.msra.mxu1 %v2341_v27  ;;  %v1256_v27 = vld [vmem:[#allocation13 + $0x20] sm:$0xff] (!%p1902_p5) }
 0x174   : > { %2399 = vmatprep.subr.bf16.mxu1 (!%p1902_p5), %v3081_v17 }
 0x176   : > { %2350 = vmatpush1.bf16.msra.mxu0 %v2349_v55 }
 0x177   : > { %2352 = vmatprep.subr.bf16.mxu0 %v2351_v56 }
 0x17a   : > { %2354 = vmatpush1.bf16.msra.mxu0 %v2353_v61 }
 0x17b   : > { %2356 = vmatprep.subr.bf16.mxu0 %v2355_v62 }
 0x17e   : > { %2358 = vmatpush1.bf16.msra.mxu0 %v2357_v39 }
 0x17f   : > { %2360 = vmatprep.subr.bf16.mxu0 %v2359_v3  ;;  %v783_v3 = vld [vmem:[#allocation3] sm:$0xff] }
 0x182   : > { %2362 = vmatpush1.bf16.msra.mxu0 %v2361_v9 }
 0x183   : > { %2364 = vmatprep.subr.bf16.mxu0 %v2363_v10 }
 0x186   : > { %2366 = vmatpush1.bf16.msra.mxu0 %v2365_v15  ;;  %v1253_v15 = vld [vmem:[#allocation13 + $0x8] sm:$0xff] (!%p1902_p5) }
 0x187   : > { %2368 = vmatprep.subr.bf16.mxu0 %v2367_v16  ;;  %v1347_v16 = vld [vmem:[#allocation15] sm:$0xff] (!%p1902_p5)  ;;  %v2376_v18 = vpack.c.bf16 (!%p1902_p5), %v1253_v15, %v1252_v14  ;;  %v1462_v15 = vld [vmem:[#allocation18 + $0x28] sm:$0xff] (!%p1902_p5) }
 0x188   : > { %v1461_v14 = vld [vmem:[#allocation18 + $0x20] sm:$0xff] (!%p1902_p5) }
 0x18a   : > { %2370 = vmatpush1.bf16.msra.mxu0 %v2369_v19  ;;  %v1348_v19 = vld [vmem:[#allocation15 + $0x8] sm:$0xff] (!%p1902_p5) }
 0x18b   : > { %2372 = vmatprep.subr.bf16.mxu0 %v2371_v26  ;;  %v2400_v22 = vpack.c.bf16 (!%p1902_p5), %v1348_v19, %v1347_v16  ;;  %v2403_v26 = vpack.c.bf16 (!%p1902_p5), %v1350_v23, %v1349_v4  ;;  %v1445_v16 = vld [vmem:[#allocation16 + $0x20] sm:$0xff] (!%p1902_p5)  ;;  %v1448_v4 = vld [vmem:[#allocation16 + $0x38] sm:$0xff] (!%p1902_p5)  ;;  %v2433_v23 = vpack.c.bf16 (!%p1902_p5), %v1464_v21, %v1463_v20 }
 0x18e   : > { %2374 = vmatpush1.bf16.msra.mxu0 %v2373_v30  ;;  %v1352_v30 = vld [vmem:[#allocation15 + $0x28] sm:$0xff] (!%p1902_p5) }
 0x18f   : > { %2375 = vmatprep.subr.bf16.mxu0 (!%p1902_p5), %v3081_v17 }
 0x224   : > { %v777_v32 = vpop.f32.mrb[0].mxu0 }
 0x225   : > { %v778_v33 = vadd.f32 %v1901_v31, %v777_v32  ;;  %v2047_v34 = vpop.f32.mrb[1].mxu0  ;;  %v2382_v31 = vpack.c.bf16 (!%p1902_p5), %v1257_v28, %v1256_v27  ;;  %v2406_v32 = vpack.c.bf16 (!%p1902_p5), %v1352_v30, %v1351_v29  ;;  %v1466_v27 = vld [vmem:[#allocation18 + $0x48] sm:$0xff] (!%p1902_p5)  ;;  %v1449_v28 = vld [vmem:[#allocation16 + $0x40] sm:$0xff] (!%p1902_p5) }
 0x226   : > { %v1259_v34 = vld [vmem:[#allocation13 + $0x38] sm:$0xff] (!%p1902_p5)  ;;  %v1450_v29 = vld [vmem:[#allocation16 + $0x48] sm:$0xff] (!%p1902_p5) }
 0x227   : > { %v781_v35 = vmax.f32 %v778_v33, 0.0  ;;  %v1258_v33 = vld [vmem:[#allocation13 + $0x30] sm:$0xff] (!%p1902_p5) }
 0x228   : > { %v2385_v37 = vpack.c.bf16 (!%p1902_p5), %v1259_v34, %v1258_v33  ;;  %v1468_v33 = vld [vmem:[#allocation18 + $0x58] sm:$0xff] (!%p1902_p5)  ;;  %v1451_v34 = vld [vmem:[#allocation16 + $0x50] sm:$0xff] (!%p1902_p5) }
 0x229   : > { %1119 = vmatmul.mubr.f32.vlgmr.msra.gmra.mrb[0].mxu1 %v781_v35  ;;  %1190 = vmatmul.mubr.f32.vlgmr.msra.gmra.mrb[2].mxu0 %v781_v35  ;;  %v1353_v35 = vld [vmem:[#allocation15 + $0x30] sm:$0xff] (!%p1902_p5) }
 0x22a   : > { %2080 = vmatprep.mubr.msk.f32.mxu0 (!%p1902_p5), %vm3082_vm1, %v3083_v24  ;;  %2115 = vmatprep.mubr.msk.f32.mxu1 (!%p1902_p5), %vm3082_vm1, %v3083_v24  ;;  %v2409_v38 = vpack.c.bf16 (!%p1902_p5), %v1354_v36, %v1353_v35  ;;  %v1452_v35 = vld [vmem:[#allocation16 + $0x58] sm:$0xff] (!%p1902_p5) }
 0x22b   : > { %2377 = vmatpush3.bf16.msra.mxu0 (!%p1902_p5), %v2376_v18  ;;  %2401 = vmatpush3.bf16.msra.mxu1 (!%p1902_p5), %v2400_v22  ;;  %v1446_v18 = vld [vmem:[#allocation16 + $0x28] sm:$0xff] (!%p1902_p5)  ;;  %v1447_v22 = vld [vmem:[#allocation16 + $0x30] sm:$0xff] (!%p1902_p5) }
 0x22c   : > { %2378 = vmatprep.subr.bf16.mxu0 (!%p1902_p5), %v3081_v17  ;;  %2402 = vmatprep.subr.bf16.mxu1 (!%p1902_p5), %v3081_v17  ;;  %v2454_v19 = vpack.c.bf16 (!%p1902_p5), %v1446_v18, %v1445_v16  ;;  %v1635_v16 = vld [vmem:[#allocation19 + $0x68] sm:$0xff] (!%p1902_p5) }
 0x22f   : > { %2380 = vmatpush3.bf16.msra.mxu0 (!%p1902_p5), %v2379_v25  ;;  %2404 = vmatpush3.bf16.msra.mxu1 (!%p1902_p5), %v2403_v26  ;;  %v2457_v25 = vpack.c.bf16 (!%p1902_p5), %v1448_v4, %v1447_v22  ;;  %v1465_v26 = vld [vmem:[#allocation18 + $0x40] sm:$0xff] (!%p1902_p5)  ;;  %v1905_v4 = vld [vmem:[%s3736_s29] ss:$0 sm:$0xff] (!%p1902_p5) }
 0x230   : > { %2381 = vmatprep.subr.bf16.mxu0 (!%p1902_p5), %v3081_v17  ;;  %2405 = vmatprep.subr.bf16.mxu1 (!%p1902_p5), %v3081_v17  ;;  %v2436_v30 = vpack.c.bf16 (!%p1902_p5), %v1466_v27, %v1465_v26 }
 0x233   : > { %2383 = vmatpush3.bf16.msra.mxu0 (!%p1902_p5), %v2382_v31  ;;  %2407 = vmatpush3.bf16.msra.mxu1 (!%p1902_p5), %v2406_v32  ;;  %v2460_v31 = vpack.c.bf16 (!%p1902_p5), %v1450_v29, %v1449_v28  ;;  %v1467_v32 = vld [vmem:[#allocation18 + $0x50] sm:$0xff] (!%p1902_p5) }
 0x234   : > { %2384 = vmatprep.subr.bf16.mxu0 (!%p1902_p5), %v3081_v17  ;;  %2408 = vmatprep.subr.bf16.mxu1 (!%p1902_p5), %v3081_v17  ;;  %v2439_v36 = vpack.c.bf16 (!%p1902_p5), %v1468_v33, %v1467_v32 }
 0x237   : > { %2386 = vmatpush3.bf16.msra.mxu0 (!%p1902_p5), %v2385_v37  ;;  %2410 = vmatpush3.bf16.msra.mxu1 (!%p1902_p5), %v2409_v38  ;;  %v2463_v37 = vpack.c.bf16 (!%p1902_p5), %v1452_v35, %v1451_v34  ;;  %v1469_v38 = vld [vmem:[#allocation18 + $0x60] sm:$0xff] (!%p1902_p5) }
 0x238   : > { %2387 = vmatprep.subr.bf16.mxu0 (!%p1902_p5), %v3081_v17  ;;  %2411 = vmatprep.subr.bf16.mxu1 (!%p1902_p5), %v3081_v17 }
 0x23b   : > { %2389 = vmatpush3.bf16.msra.mxu0 (!%p1902_p5), %v2388_v44 }
 0x23c   : > { %2390 = vmatprep.subr.bf16.mxu0 (!%p1902_p5), %v3081_v17 }
 0x2fc   : > { %v1120_v45 = vpop.f32.mrb[0].mxu1  ;;  %v1191_v46 = vpop.f32.mrb[2].mxu0 }
 0x2fd   : > { %v1218_v47 = vadd.f32 %v1201_v42, %v1120_v45  ;;  %v1122_v48 = vpop.f32.mrb[1].mxu1  ;;  %v1193_v49 = vpop.f32.mrb[3].mxu0  ;;  %v1220_v61 = vadd.f32 %v1209_v59, %v1191_v46  ;;  %v1355_v42 = vld [vmem:[#allocation15 + $0x40] sm:$0xff] (!%p1902_p5)  ;;  %v1262_v46 = vld [vmem:[#allocation13 + $0x50] sm:$0xff] (!%p1902_p5)  ;;  %v1267_v59 = vld [vmem:[#allocation13 + $0x78] sm:$0xff] (!%p1902_p5) }
 0x2fe   : > { %v1219_v50 = vadd.f32 %v1205_v43, %v1122_v48  ;;  %v1221_v56 = vadd.f32 %v1213_v51, %v1193_v49  ;;  %v1356_v43 = vld [vmem:[#allocation15 + $0x48] sm:$0xff] (!%p1902_p5)  ;;  %v1357_v48 = vld [vmem:[#allocation15 + $0x50] sm:$0xff] (!%p1902_p5)  ;;  %v1358_v49 = vld [vmem:[#allocation15 + $0x58] sm:$0xff] (!%p1902_p5) }
 0x2ff   : > { %v1222_v52 = vsub.f32 0.0, %v1218_v47  ;;  %v2412_v45 = vpack.c.bf16 (!%p1902_p5), %v1356_v43, %v1355_v42  ;;  %v1263_v47 = vld [vmem:[#allocation13 + $0x58] sm:$0xff] (!%p1902_p5)  ;;  %v2415_v51 = vpack.c.bf16 (!%p1902_p5), %v1358_v49, %v1357_v48  ;;  %v1454_v42 = vld [vmem:[#allocation16 + $0x68] sm:$0xff] (!%p1902_p5)  ;;  %v2442_v43 = vpack.c.bf16 (!%p1902_p5), %v1470_v40, %v1469_v38 }
 0x300   : > { %v1228_v53 = vsub.f32 0.0, %v1219_v50  ;;  %v1235_v58 = vsub.f32 0.0, %v1221_v56  ;;  %v2391_v50 = vpack.c.bf16 (!%p1902_p5), %v1263_v47, %v1262_v46  ;;  %v2466_v44 = vpack.c.bf16 (!%p1902_p5), %v1454_v42, %v1453_v41  ;;  %v1472_v46 = vld [vmem:[#allocation18 + $0x78] sm:$0xff] (!%p1902_p5)  ;;  %v1455_v47 = vld [vmem:[#allocation16 + $0x70] sm:$0xff] (!%p1902_p5) }
 0x301   : > { %v1223_v54 = vmul.f32 1.442695, %v1222_v52  ;;  %2413 = vmatpush3.bf16.msra.mxu1 (!%p1902_p5), %v2412_v45  ;;  %v1264_v52 = vld [vmem:[#allocation13 + $0x60] sm:$0xff] (!%p1902_p5)  ;;  %v1471_v45 = vld [vmem:[#allocation18 + $0x70] sm:$0xff] (!%p1902_p5)  ;;  %v1456_v49 = vld [vmem:[#allocation16 + $0x78] sm:$0xff] (!%p1902_p5) }
 0x302   : > { %v1229_v55 = vmul.f32 1.442695, %v1228_v53  ;;  %v1236_v60 = vmul.f32 1.442695, %v1235_v58  ;;  %v1265_v53 = vld [vmem:[#allocation13 + $0x68] sm:$0xff] (!%p1902_p5)  ;;  %2414 = vmatprep.subr.bf16.mxu1 (!%p1902_p5), %v3081_v17  ;;  %2392 = vmatpush3.bf16.msra.mxu0 (!%p1902_p5), %v2391_v50  ;;  %v1266_v58 = vld [vmem:[#allocation13 + $0x70] sm:$0xff] (!%p1902_p5)  ;;  %v2445_v48 = vpack.c.bf16 (!%p1902_p5), %v1472_v46, %v1471_v45  ;;  %v2469_v50 = vpack.c.bf16 (!%p1902_p5), %v1456_v49, %v1455_v47 }
 0x303   : > { %2663 = vpow2.f32 %v1223_v54  ;;  %v1359_v54 = vld [vmem:[#allocation15 + $0x60] sm:$0xff] (!%p1902_p5)  ;;  %v2394_v56 = vpack.c.bf16 (!%p1902_p5), %v1265_v53, %v1264_v52  ;;  %2393 = vmatprep.subr.bf16.mxu0 (!%p1902_p5), %v3081_v17  ;;  %v1904_v52 = vld [vmem:[%s3735_s13] ss:$0 sm:$0xff] (!%p1902_p5) }
 0x304   : > { %2665 = vpow2.f32 %v1229_v55  ;;  %v1360_v55 = vld [vmem:[#allocation15 + $0x68] sm:$0xff] (!%p1902_p5) }
 0x305   : > { %2667 = vpow2.f32 %v1236_v60  ;;  %2416 = vmatpush3.bf16.msra.mxu1 (!%p1902_p5), %v2415_v51  ;;  %v2418_v57 = vpack.c.bf16 (!%p1902_p5), %v1360_v55, %v1359_v54  ;;  %v1361_v60 = vld [vmem:[#allocation15 + $0x70] sm:$0xff] (!%p1902_p5)  ;;  %v1903_v51 = vld [vmem:[%s3734_s21] ss:$0 sm:$0xff] (!%p1902_p5)  ;;  %v1622_v54 = vld [vmem:[#allocation19] sm:$0xff] (!%p1902_p5) }
 0x306   : > { %2669 = vtanh.f32 %v1220_v61  ;;  %2417 = vmatprep.subr.bf16.mxu1 (!%p1902_p5), %v3081_v17  ;;  %v1362_v61 = vld [vmem:[#allocation15 + $0x78] sm:$0xff] (!%p1902_p5)  ;;  %2395 = vmatpush3.bf16.msra.mxu0 (!%p1902_p5), %v2394_v56  ;;  %v1623_v55 = vld [vmem:[#allocation19 + $0x8] sm:$0xff] (!%p1902_p5) }
 0x307   : > { %2396 = vmatprep.subr.bf16.mxu0 (!%p1902_p5), %v3081_v17 }
 0x309   : > { %2419 = vmatpush3.bf16.msra.mxu1 (!%p1902_p5), %v2418_v57 }
 0x30a   : > { %2420 = vmatprep.subr.bf16.mxu1 (!%p1902_p5), %v3081_v17 }
 0x30d   : > { %v2664_v62 = vpop.eup %2663 }
 0x30e   : > { %v2666_v63 = vpop.eup %2665  ;;  %v1225_v0 = vadd.f32 1.0, %v2664_v62  ;;  %v2397_v62 = vpack.c.bf16 (!%p1902_p5), %v1267_v59, %v1266_v58 }
 0x30f   : > { %v1231_v1 = vadd.f32 1.0, %v2666_v63  ;;  %v2668_v2 = vpop.eup %2667  ;;  %v2421_v63 = vpack.c.bf16 (!%p1902_p5), %v1362_v61, %v1361_v60 }
 0x310   : > { %2671 = vrcp.f32 %v1225_v0  ;;  %v2670_v39 = vpop.eup %2669  ;;  %v1238_v8 = vadd.f32 1.0, %v2668_v2  ;;  %v1457_v0 = vld [vmem:[#allocation18] sm:$0xff] (!%p1902_p5)  ;;  %2398 = vmatpush3.bf16.msra.mxu0 (!%p1902_p5), %v2397_v62  ;;  %v2472_v62 = vpack.c.bf16 (!%p1902_p5), %v1623_v55, %v1622_v54 }
 0x311   : > { %2673 = vrcp.f32 %v1231_v1  ;;  %v1458_v1 = vld [vmem:[#allocation18 + $0x8] sm:$0xff] (!%p1902_p5)  ;;  %v1441_v2 = vld [vmem:[#allocation16] sm:$0xff] (!%p1902_p5)  ;;  %2422 = vmatpush3.bf16.msra.mxu1 (!%p1902_p5), %v2421_v63  ;;  %2423 = vmatprep.subr.bf16.mxu0 (!%p1902_p5), %v3081_v17 }
 0x312   : > { %2675 = vrcp.f32 %v1238_v8  ;;  %v1460_v8 = vld [vmem:[#allocation18 + $0x18] sm:$0xff] (!%p1902_p5)  ;;  %2447 = vmatprep.subr.bf16.mxu1 (!%p1902_p5), %v3081_v17 }
 0x31a   : > { %v2672_v5 = vpop.eup %2671 }
 0x31b   : > { %v2674_v7 = vpop.eup %2673  ;;  %v1242_v6 = vmul.f32 %v2672_v5, %v2670_v39  ;;  %v1442_v39 = vld [vmem:[#allocation16 + $0x8] sm:$0xff] (!%p1902_p5)  ;;  %v1346_v5 = vld [vmem:[#allocation7] sm:$0xff] (!%p1902_p5) }
 0x31c   : > { %v1241_v9 = vmul.f32 %v2674_v7, %v783_v3  ;;  %v2676_v11 = vpop.eup %2675  ;;  %v2424_v3 = vpack.c.bf16 (!%p1902_p5), %v1458_v1, %v1457_v0  ;;  %v2448_v7 = vpack.c.bf16 (!%p1902_p5), %v1442_v39, %v1441_v2  ;;  %2116 = vmatmul.mubr.f32.vlgmr.msra.gmra.mrb[0].mxu1 (!%p1902_p5), %v1346_v5  ;;  %v1624_v0 = vld [vmem:[#allocation19 + $0x10] sm:$0xff] (!%p1902_p5)  ;;  %v1625_v1 = vld [vmem:[#allocation19 + $0x18] sm:$0xff] (!%p1902_p5)  ;;  %v1626_v39 = vld [vmem:[#allocation19 + $0x20] sm:$0xff] (!%p1902_p5) }
 0x31d   : > { %2185 = vmatprep.mubr.msk.f32.mxu1 (!%p1902_p5), %vm3082_vm1, %v3083_v24  ;;  %v2475_v2 = vpack.c.bf16 (!%p1902_p5), %v1625_v1, %v1624_v0 }
 0x31e   : > { %v1243_v10 = vadd.f32 %v1242_v6, %v1241_v9  ;;  %v1459_v6 = vld [vmem:[#allocation18 + $0x10] sm:$0xff] (!%p1902_p5)  ;;  %2449 = vmatpush3.bf16.msra.mxu1 (!%p1902_p5), %v2448_v7 }
 0x31f   : > { %v1443_v9 = vld [vmem:[#allocation16 + $0x10] sm:$0xff] (!%p1902_p5)  ;;  %2450 = vmatprep.subr.bf16.mxu1 (!%p1902_p5), %v3081_v17 }
 0x320   : > { %2677 = vtanh.f32 %v1243_v10  ;;  %1247 = vst [vmem:[#allocation3] sm:$0xff] %v1243_v10  ;;  %v1444_v10 = vld [vmem:[#allocation16 + $0x18] sm:$0xff] (!%p1902_p5)  ;;  %v1628_v7 = vld [vmem:[#allocation19 + $0x30] sm:$0xff] (!%p1902_p5) }
 0x327   : > { %1251 = sbr.rel (%p1902_p5) target bundleno = 1462 (0x5b6), region = 132 }
 0x32a   : > { %v2678_v12 = vpop.eup %2677 }
 0x32b   : > { %v3562_v13 = vmul.f32 %v2678_v12, %v2676_v11  ;;  %v2427_v11 = vpack.c.bf16 (!%p1902_p5), %v1460_v8, %v1459_v6  ;;  %v2451_v12 = vpack.c.bf16 (!%p1902_p5), %v1444_v10, %v1443_v9  ;;  %v1629_v6 = vld [vmem:[#allocation19 + $0x38] sm:$0xff] (!%p1902_p5)  ;;  %v1630_v9 = vld [vmem:[#allocation19 + $0x40] sm:$0xff] (!%p1902_p5)  ;;  %v1631_v10 = vld [vmem:[#allocation19 + $0x48] sm:$0xff] (!%p1902_p5) }
 0x32c   : > { %v2481_v8 = vpack.c.bf16 (!%p1902_p5), %v1629_v6, %v1628_v7 }
 0x32d   : > { %1246 = vst [vmem:[#allocation2] sm:$0xff] %v3562_v13  ;;  %2081 = vmatmul.mubr.f32.vlgmr.msra.gmra.mrb[0].mxu0 (!%p1902_p5), %v3562_v13  ;;  %v2430_v13 = vpack.c.bf16 (!%p1902_p5), %v1462_v15, %v1461_v14  ;;  %2452 = vmatpush3.bf16.msra.mxu1 (!%p1902_p5), %v2451_v12  ;;  %v1633_v12 = vld [vmem:[#allocation19 + $0x58] sm:$0xff] (!%p1902_p5)  ;;  %v1634_v15 = vld [vmem:[#allocation19 + $0x60] sm:$0xff] (!%p1902_p5) }
 0x32e   : > { %2425 = vmatpush3.bf16.msra.mxu0 %v2424_v3  ;;  %2150 = vmatprep.mubr.msk.f32.mxu0 %vm3082_vm1, %v3083_v24  ;;  %v1627_v3 = vld [vmem:[#allocation19 + $0x28] sm:$0xff]  ;;  %v2490_v18 = vpack.c.bf16 %v1635_v16, %v1634_v15 }
 0x32f   : > { %2426 = vmatprep.subr.bf16.mxu0 %v3081_v17  ;;  %2453 = vmatprep.subr.bf16.mxu1 %v3081_v17  ;;  %v2478_v5 = vpack.c.bf16 %v1627_v3, %v1626_v39 }
 0x331   : > { %2455 = vmatpush3.bf16.msra.mxu1 %v2454_v19  ;;  %v1637_v19 = vld [vmem:[#allocation19 + $0x78] sm:$0xff] }
 0x332   : > { %2428 = vmatpush3.bf16.msra.mxu0 %v2427_v11  ;;  %2456 = vmatprep.subr.bf16.mxu1 %v3081_v17  ;;  %v2484_v11 = vpack.c.bf16 %v1631_v10, %v1630_v9 }
 0x333   : > { %2429 = vmatprep.subr.bf16.mxu0 %v3081_v17 }
 0x335   : > { %2458 = vmatpush3.bf16.msra.mxu1 %v2457_v25 }
 0x336   : > { %2431 = vmatpush3.bf16.msra.mxu0 %v2430_v13  ;;  %2459 = vmatprep.subr.bf16.mxu1 %v3081_v17  ;;  %v1636_v13 = vld [vmem:[#allocation19 + $0x70] sm:$0xff] }
 0x337   : > { %2432 = vmatprep.subr.bf16.mxu0 %v3081_v17  ;;  %v2493_v20 = vpack.c.bf16 %v1637_v19, %v1636_v13 }
 0x339   : > { %2461 = vmatpush3.bf16.msra.mxu1 %v2460_v31 }
 0x33a   : > { %2434 = vmatpush3.bf16.msra.mxu0 %v2433_v23  ;;  %2462 = vmatprep.subr.bf16.mxu1 %v3081_v17 }
 0x33b   : > { %2435 = vmatprep.subr.bf16.mxu0 %v3081_v17 }
 0x33d   : > { %2464 = vmatpush3.bf16.msra.mxu1 %v2463_v37 }
 0x33e   : > { %2437 = vmatpush3.bf16.msra.mxu0 %v2436_v30  ;;  %2465 = vmatprep.subr.bf16.mxu1 %v3081_v17 }
 0x33f   : > { %2438 = vmatprep.subr.bf16.mxu0 %v3081_v17 }
 0x341   : > { %2467 = vmatpush3.bf16.msra.mxu1 %v2466_v44 }
 0x342   : > { %2440 = vmatpush3.bf16.msra.mxu0 %v2439_v36  ;;  %2468 = vmatprep.subr.bf16.mxu1 %v3081_v17 }
 0x343   : > { %2441 = vmatprep.subr.bf16.mxu0 %v3081_v17 }
 0x345   : > { %2470 = vmatpush3.bf16.msra.mxu1 %v2469_v50 }
 0x346   : > { %2443 = vmatpush3.bf16.msra.mxu0 %v2442_v43 }
 0x347   : > { %2444 = vmatprep.subr.bf16.mxu0 %v3081_v17 }
 0x34a   : > { %2446 = vmatpush3.bf16.msra.mxu0 %v2445_v48 }
 0x34b   : > { %2471 = vmatprep.subr.bf16.mxu0 %v3081_v17 }
 0x3ef   : > { %v1436_v57 = vpop.f32.mrb[0].mxu1 }
 0x3f0   : > { %v1437_v59 = vadd.f32 %v1904_v52, %v1436_v57  ;;  %v2117_v60 = vpop.f32.mrb[1].mxu1 }
 0x3f2   : > { %v1440_v63 = vmax.f32 %v1437_v59, 0.0 }
 0x3f4   : > { %2151 = vmatmul.mubr.f32.vlgmr.msra.gmra.mrb[2].mxu0 %v1440_v63 }
 0x3f5   : > { %2473 = vmatpush3.bf16.msra.mxu0 %v2472_v62  ;;  %2220 = vmatprep.mubr.msk.f32.mxu0 %vm3082_vm1, %v3083_v24  ;;  %v1632_v24 = vld [vmem:[#allocation19 + $0x50] sm:$0xff] }
 0x3f6   : > { %2474 = vmatprep.subr.bf16.mxu0 %v3081_v17  ;;  %v2487_v14 = vpack.c.bf16 %v1633_v12, %v1632_v24 }
 0x3f9   : > { %2476 = vmatpush3.bf16.msra.mxu0 %v2475_v2 }
 0x3fa   : > { %2477 = vmatprep.subr.bf16.mxu0 %v3081_v17 }
 0x3fd   : > { %2479 = vmatpush3.bf16.msra.mxu0 %v2478_v5 }
 0x3fe   : > { %2480 = vmatprep.subr.bf16.mxu0 %v3081_v17 }
 0x400   : > { %v1341_v53 = vpop.f32.mrb[0].mxu0 }
 0x401   : > { %v1342_v56 = vadd.f32 %v1903_v51, %v1341_v53  ;;  %v2082_v58 = vpop.f32.mrb[1].mxu0  ;;  %2482 = vmatpush3.bf16.msra.mxu0 %v2481_v8 }
 0x402   : > { %2483 = vmatprep.subr.bf16.mxu0 %v3081_v17 }
 0x403   : > { %v1345_v61 = vmax.f32 %v1342_v56, 0.0 }
 0x405   : > { %2186 = vmatmul.mubr.f32.vlgmr.msra.gmra.mrb[2].mxu1 %v1345_v61  ;;  %2485 = vmatpush3.bf16.msra.mxu0 %v2484_v11 }
 0x406   : > { %2486 = vmatprep.subr.bf16.mxu0 %v3081_v17 }
 0x409   : > { %2488 = vmatpush3.bf16.msra.mxu0 %v2487_v14 }
 0x40a   : > { %2489 = vmatprep.subr.bf16.mxu0 %v3081_v17 }
 0x40d   : > { %2491 = vmatpush3.bf16.msra.mxu0 %v2490_v18 }
 0x40e   : > { %2492 = vmatprep.subr.bf16.mxu0 %v3081_v17  ;;  %v1906_v17 = vld [vmem:[%s3737_s18] ss:$0 sm:$0xff] }
 0x411   : > { %2494 = vmatpush3.bf16.msra.mxu0 %v2493_v20 }
 0x4c7   : > { %v1539_v22 = vpop.f32.mrb[2].mxu0 }
 0x4c8   : > { %v2152_v26 = vpop.f32.mrb[3].mxu0 }
 0x4d8   : > { %v1609_v21 = vpop.f32.mrb[2].mxu1 }
 0x4d9   : > { %v2187_v23 = vpop.f32.mrb[3].mxu1  ;;  %v1610_v25 = vadd.f32 %v1609_v21, %v1539_v22 }
 0x4db   : > { %v1620_v27 = vadd.f32 %v1905_v4, %v1610_v25 }
 0x4dd   : > { %v1621_v28 = vmax.f32 %v1620_v27, 0.0 }
 0x4df   : > { %2221 = vmatmul.mubr.f32.vlgmr.msra.gmra.mrb[4].mxu0 %v1621_v28 }
 0x5b2   : > { %v1711_v29 = vpop.f32.mrb[4].mxu0 }
 0x5b3   : > { %v1712_v30 = vadd.f32 %v1906_v17, %v1711_v29  ;;  %v2222_v31 = vpop.f32.mrb[5].mxu0 }
 0x5b5   : > { %1715 = vst [vmem:[#allocation21] sm:$0xff] %v1712_v30 }
 0x5b6 PF: > { %s3738_s16 = sadd.s32 4294967295, %s3061_s26   ;;  %s3084_s6 = smov [#allocation21]  }
 0x5b7   : > { %p3631_p9 = scmp.eq.s32.totalorder %s3738_s16, 7  ;;  %s1725_s20 = sshll.u32 %s3084_s6, 4  ;;  %s1726_s20 = int_to_ptr.vmem [resolvable:$true] %s1725_s20 }
 0x5b8   : > { %s2961_s24 = scalar_lea.vmem %s1726_s20, 128  ;;  %p2968_p11 = scmp.lt.s32.totalorder %s1726_s20, %s1726_s20 }
 0x5b9   : > { %p2962_p1 = scmp.ne.s32.totalorder %s1726_s20, %s2961_s24  ;;  %p2969_p13 = scmp.lt.s32.totalorder %s2961_s24, %s2961_s24 }
 0x5bb   : > { %p2963_p3 = pnand %p2962_p1, %p3631_p9  ;;  %p2970_p2 = por %p2969_p13, %p2968_p11 }
 0x5bd   : > { %p2964_p10 = pneg %p2963_p3 }
 0x5bf   : > { %p2971_p7 = pnand %p2970_p2, %p2964_p10 }
 0x5c1   : > { %2974 = shalt.err (!%p2971_p7)
}
 0x5c2   : > { %s3740_s15 = sld [smem:[#allocation38_spill]] }
 0x5c8   : > { %s2975_s30 = scalar_lea.hbm %s3740_s15, 128 }
 0x5c9   : > { %p2976_p6 = scmp.ne.s32.totalorder %s3740_s15, %s2975_s30  ;;  %p2981_p0 = scmp.lt.u32.totalorder %s2975_s30, %s3740_s15 }
 0x5cb   : > { %p2977_p8 = pnand %p2976_p6, %p3631_p9 }
 0x5cd   : > { %p2978_p4 = pneg %p2977_p8 }
 0x5cf   : > { %p2983_p12 = pnand %p2981_p0, %p2978_p4 }
 0x5d1   : > { %2986 = shalt.err (!%p2983_p12)
}
 0x5d2   : > { %2538 = dma.vmem_to_hbm [thread:$0]  (%p3631_p9), %s1726_s20, 128, %s3740_s15, [#allocation6]  }
 0x5d3   : > { %3036 = dma.done.wait (%p3631_p9), [#allocation6], 128  }
 0x5d4   : > { %3038 = vsyncadd (%p3631_p9), [#allocation6], 4294967168 }
 0x5d5 PF: > { %s35_s26 = sadd.s32 1, %s3061_s26   ;;  %s3741_s21 = smov %s3045_s22 }
 0x5d6   : > { %p32_p5 = scmp.ge.s32.totalorder %s35_s26, 10   ;;  %s3742_s22 = smov %s3049_s23 }
 0x5d7   : > { %s3743_s23 = smov %s3466_s8  ;;  %s3744_s24 = smov %s3057_s25 }
 0x5d8   : > { %s3745_s25 = smov %s3747_s19  ;;  %34 = sbr.rel (!%p32_p5) target bundleno = 20 (0x14), region = 167 }
 0x5df   :  { %1738 = vsyncpa [#allocation5], 1 }
 0x5e0   :  { %1740 = vsyncpa [#allocation5 + $0x1], 1 }
 0x5e1   :  { %1741 = vsyncpa [#allocation8], 1 }
 0x5e2   :  { %1742 = vsyncpa [#allocation11], 1 }
 0x5e3   :  { %1743 = vsyncpa [#allocation14], 1 }
 0x5e4   :  { %1744 = vsyncpa [#allocation17], 1 }
 0x5e5   :  { %1745 = vsyncpa [#allocation20], 1 }
 0x5e6   :  { %1746 = vsyncpa [#allocation6], 1 }
 0x5e7   :  { %1748 = vsyncpa [#allocation6 + $0x1], 1 }

</bundles_post_ra>
